<compile_context>
chip_gen: v6e
topology: v6e:2x2x1
jax: 0.10.0
libtpu: 0.0.40
codegen_flags: <defaults>
</compile_context>

<pallas_src>
import jax
import jax.numpy as jnp
import numpy as np
from jax import lax
from jax.experimental import pallas as pl
from jax.experimental.pallas import tpu as pltpu


# ------------------------- fused hex-conv stack kernel -------------------------

def _hex_stack_kernel(x_ref, w_ref, b_ref, o_ref, padded):
    """One grid step == one HexBlock layer: act = relu(hexconv(act)).

    x_ref  : (B, H, W, C)  input activations (channel-padded), read only at layer 0
    w_ref  : (1, 7, C, C)  this layer's 7 hex-tap weight matrices, (cin, cout) each
    b_ref  : (1, 1, C)     this layer's bias
    o_ref  : (B, H, W, C)  final stack output (written at the last layer)
    padded : VMEM (B, H+2, W+2, C) activation with zero halo; persists across layers
    """
    B, H, W, C = o_ref.shape
    layer = pl.program_id(0)
    n_layers = pl.num_programs(0)

    @pl.when(layer == 0)
    def _init():
        padded[...] = jnp.zeros_like(padded)
        padded[:, 1:H + 1, 1:W + 1, :] = x_ref[...]

    def tap(dr, dc):
        # Shifted view of the halo-padded activation (halo supplies the zeros).
        return padded[:, 1 + dr:1 + dr + H, 1 + dc:1 + dc + W, :]

    # Column-parity mask (hex offset convention: even columns shifted up).
    # TODO(synk): flip parity here if hexagdly's convention shifts odd columns.
    col = lax.broadcasted_iota(jnp.int32, (B, H, W, C), 2)
    even = (col & 1) == 0

    taps = [
        tap(0, 0),                                   # center
        tap(-1, 0),                                  # up
        tap(1, 0),                                   # down
        jnp.where(even, tap(-1, -1), tap(0, -1)),    # left-top
        jnp.where(even, tap(0, -1), tap(1, -1)),     # left-bottom
        jnp.where(even, tap(-1, 1), tap(0, 1)),      # right-top
        jnp.where(even, tap(0, 1), tap(1, 1)),       # right-bottom
    ]

    # 7 accumulate-matmuls on the MXU, f32 accumulator.
    acc = jnp.dot(taps[0].reshape(B * H * W, C), w_ref[0, 0],
                  preferred_element_type=jnp.float32)
    for t in range(1, 7):
        acc += jnp.dot(taps[t].reshape(B * H * W, C), w_ref[0, t],
                       preferred_element_type=jnp.float32)

    act = jnp.maximum(acc + b_ref[0], 0.0)           # bias + ReLU in f32
    act4 = act.reshape(B, H, W, C)

    # Feed the next layer: overwrite only the interior, halo stays zero.
    padded[:, 1:H + 1, 1:W + 1, :] = act4

    @pl.when(layer == n_layers - 1)
    def _finalize():
        o_ref[...] = act4.astype(o_ref.dtype)


def hex_stack(x_bhwc, hex_w, hex_b):
    """Run all HexBlocks in one pallas_call. x:(B,H,W,C) f32, hex_w:(L,7,C,C), hex_b:(L,1,C)."""
    B, H, W, C = x_bhwc.shape
    L = hex_w.shape[0]
    return pl.pallas_call(
        _hex_stack_kernel,
        out_shape=jax.ShapeDtypeStruct((B, H, W, C), jnp.float32),
        grid_spec=pltpu.PrefetchScalarGridSpec(
            num_scalar_prefetch=0,
            grid=(L,),
            in_specs=[
                pl.BlockSpec((B, H, W, C), lambda l: (0, 0, 0, 0)),   # input, resident
                pl.BlockSpec((1, 7, C, C), lambda l: (l, 0, 0, 0)),   # per-layer weights
                pl.BlockSpec((1, 1, C), lambda l: (l, 0, 0)),         # per-layer bias
            ],
            out_specs=pl.BlockSpec((B, H, W, C), lambda l: (0, 0, 0, 0)),
            scratch_shapes=[pltpu.VMEM((B, H + 2, W + 2, C), jnp.float32)],
        ),
        compiler_params=pltpu.CompilerParams(
            dimension_semantics=("arbitrary",),   # layers are sequential (stateful scratch)
        ),
    )(x_bhwc, hex_w, hex_b)


# ------------------------------- linear + ReLU ---------------------------------

def _linear_relu_kernel(x_ref, w_ref, b_ref, o_ref, acc_ref):
    """o[:, j-tile] = relu(x @ w[:, j-tile] + b[j-tile]); K split over grid axis 1."""
    k = pl.program_id(1)

    @pl.when(k == 0)
    def _():
        acc_ref[...] = jnp.zeros_like(acc_ref)

    acc_ref[...] += jnp.dot(x_ref[...].astype(w_ref.dtype), w_ref[...],
                            preferred_element_type=jnp.float32)

    @pl.when(k == pl.num_programs(1) - 1)
    def _():
        o_ref[...] = jnp.maximum(acc_ref[...] + b_ref[...], 0.0).astype(o_ref.dtype)
        # TODO(synk): confirm Navy_VisionNetwork applies ReLU after the final Linear;
        # drop the jnp.maximum here if it does not.


def linear_relu(x, w, b, *, tn=256, tk=1024):
    """relu(x @ w + b). x:(M,K) f32, w:(K,N) bf16, b:(1,N) f32 -> (M,N) f32."""
    M, K = x.shape
    Kw, N = w.shape
    assert K == Kw
    tn = tn if N % tn == 0 else N
    tk = tk if K % tk == 0 else K
    grid = (N // tn, K // tk)
    return pl.pallas_call(
        _linear_relu_kernel,
        out_shape=jax.ShapeDtypeStruct((M, N), jnp.float32),
        grid_spec=pltpu.PrefetchScalarGridSpec(
            num_scalar_prefetch=0,
            grid=grid,
            in_specs=[
                pl.BlockSpec((M, tk), lambda j, k: (0, k)),    # activations (K-tiled)
                pl.BlockSpec((tk, tn), lambda j, k: (k, j)),   # weights (K,N-tiled, pipelined)
                pl.BlockSpec((1, tn), lambda j, k: (0, j)),    # bias
            ],
            out_specs=pl.BlockSpec((M, tn), lambda j, k: (0, j)),
            scratch_shapes=[pltpu.VMEM((M, tn), jnp.float32)],
        ),
        compiler_params=pltpu.CompilerParams(
            dimension_semantics=("parallel", "arbitrary"),
        ),
    )(x, w, b)


# ------------------------------ parameter init ---------------------------------

def init_hex_conv(key, cin, cout):
    """Mirror hexagdly.Conv2d(kernel_size=1) init. Returns taps (7, cin, cout), bias (cout,).

    Tap order: [center, up, down, left-top, left-bottom, right-top, right-bottom].
    """
    k0key, k1key, bkey = jax.random.split(key, 3)
    bound = 1.0 / np.sqrt(7 * cin)
    kernel0 = jax.random.uniform(k0key, (cout, cin, 3, 1), jnp.float32, -bound, bound)
    kernel1 = jax.random.uniform(k1key, (cout, cin, 2, 2), jnp.float32, -bound, bound)
    bias = jax.random.uniform(bkey, (cout,), jnp.float32, -bound, bound)
    taps = jnp.stack(
        [
            kernel0[:, :, 1, 0],   # center
            kernel0[:, :, 0, 0],   # up    (r-1, c)
            kernel0[:, :, 2, 0],   # down  (r+1, c)
            kernel1[:, :, 0, 0],   # left-top
            kernel1[:, :, 1, 0],   # left-bottom
            kernel1[:, :, 0, 1],   # right-top
            kernel1[:, :, 1, 1],   # right-bottom
        ],
        axis=0,
    )                                                  # (7, cout, cin)
    return jnp.transpose(taps, (0, 2, 1)), bias        # (7, cin, cout), (cout,)


def init_params(key, n_input_channels, H, W,
                convs_per_layer=64, n_residual_layers=7, features_dim=512):
    cpl = convs_per_layer
    assert n_input_channels <= cpl
    keys = jax.random.split(key, n_residual_layers + 3)

    layer_ws, layer_bs = [], []
    # 'conv' block: n_input_channels -> 64 (zero-pad cin rows so all layers share shape)
    w0, b0 = init_hex_conv(keys[0], n_input_channels, cpl)
    w0 = jnp.zeros((7, cpl, cpl), jnp.float32).at[:, :n_input_channels, :].set(w0)
    layer_ws.append(w0)
    layer_bs.append(b0)
    # 'resid1'..'resid7' blocks: 64 -> 64 (residual=False)
    for i in range(n_residual_layers):
        wi, bi = init_hex_conv(keys[1 + i], cpl, cpl)
        layer_ws.append(wi)
        layer_bs.append(bi)
    hex_w = jnp.stack(layer_ws, axis=0)                         # (L, 7, cpl, cpl) f32
    hex_b = jnp.stack(layer_bs, axis=0).reshape(-1, 1, cpl)     # (L, 1, cpl)      f32

    n_flatten = cpl * H * W
    bound = 1.0 / np.sqrt(n_flatten)
    lin_w = jax.random.uniform(keys[-2], (n_flatten, features_dim), jnp.float32, -bound, bound)
    lin_b = jax.random.uniform(keys[-1], (features_dim,), jnp.float32, -bound, bound)

    # nn.Flatten on NCHW orders features (C, H, W); the Pallas stack emits (H, W, C).
    # Fold that permutation into the linear weight once at init so the runtime
    # flatten is a free contiguous reshape.  Store in bf16 to halve the dominant
    # HBM transfer; the kernel accumulates in f32.
    lin_w_hwc = (lin_w.reshape(cpl, H, W, features_dim)
                      .transpose(1, 2, 0, 3)
                      .reshape(n_flatten, features_dim)
                      .astype(jnp.bfloat16))
    return {"hex_w": hex_w, "hex_b": hex_b,
            "lin_w_hwc": lin_w_hwc, "lin_b": lin_b.reshape(1, features_dim)}


# ---------------------------------- forward -------------------------------------

def forward(params, x_nchw):
    """TorchCustomModel_3.forward (policy features path): linear(cnn(obs.float()))."""
    x = jnp.transpose(x_nchw.astype(jnp.float32), (0, 2, 3, 1))       # NCHW -> NHWC
    B, H, W, cin = x.shape
    C = params["hex_w"].shape[-1]
    x = jnp.pad(x, ((0, 0), (0, 0), (0, 0), (0, C - cin)))            # channel-pad to C
    feat = hex_stack(x, params["hex_w"], params["hex_b"])             # fused 8-layer hex stack
    flat = feat.reshape(B, H * W * C)                                 # NHWC flatten (contiguous)
    return linear_relu(flat, params["lin_w_hwc"], params["lin_b"])    # Linear + ReLU
    # TODO(synk): value_function() relies on RLlib internals (separate value head /
    # state reshape) and is not part of this forward pass.


# ------------------------------------ main ---------------------------------------

if __name__ == "__main__":
    key = jax.random.PRNGKey(0)
    kp, kx = jax.random.split(key)

    B, C_in, H, W = 2, 4, 8, 8          # obs_space.shape == (4, 8, 8)
    params = init_params(kp, C_in, H, W)
    x = jax.random.normal(kx, (B, C_in, H, W), dtype=jnp.float32)

    fwd = jax.jit(forward)
    out = jax.block_until_ready(fwd(params, x))
    assert out.shape == (B, 512), out.shape
    assert bool(jnp.all(out >= 0.0))     # final ReLU
    assert bool(jnp.all(jnp.isfinite(out)))
    print("KERNEL_OK")
</pallas_src>

<mosaic_0001>
module attributes {stable_mosaic.version = 11 : i64} {
  func.func @_hex_stack_kernel(%arg0: i32, %arg1: memref<2x8x8x64xf32, #tpu.memory_space<vmem>>, %arg2: memref<1x7x64x64xf32, #tpu.memory_space<vmem>>, %arg3: memref<1x1x64xf32, #tpu.memory_space<vmem>>, %arg4: memref<2x8x8x64xf32, #tpu.memory_space<vmem>>, %arg5: memref<2x10x10x64xf32, #tpu.memory_space<vmem>>) attributes {dimension_semantics = [#tpu.dimension_semantics<arbitrary>], iteration_bounds = array<i64: 8>, scalar_prefetch = 0 : i64, scratch_operands = 1 : i64, tpu.core_type = #tpu.core_type<tc>, window_params = [{pipeline_mode = #tpu.pipeline_mode<synchronous>, transform_indices = @transform_0, window_bounds = array<i64: 2, 8, 8, 64>}, {transform_indices = @transform_1, window_bounds = array<i64: 1, 7, 64, 64>}, {transform_indices = @transform_2, window_bounds = array<i64: 1, 1, 64>}, {pipeline_mode = #tpu.pipeline_mode<synchronous>, transform_indices = @transform_3, window_bounds = array<i64: 2, 8, 8, 64>}]} {
    %c0_i32 = arith.constant 0 : i32
    %0 = arith.cmpi eq, %arg0, %c0_i32 : i32
    %1 = arith.extui %0 : i1 to i32
    %c0_i32_0 = arith.constant 0 : i32
    %2 = arith.cmpi ne, %1, %c0_i32_0 : i32
    scf.if %2 {
      %cst_82 = arith.constant 0.000000e+00 : f32
      %68 = vector.broadcast %cst_82 : f32 to vector<2x10x10x64xf32>
      %c0_83 = arith.constant 0 : index
      %c0_84 = arith.constant 0 : index
      %c0_85 = arith.constant 0 : index
      %c0_86 = arith.constant 0 : index
      %69 = vector.load %arg5[%c0_83, %c0_84, %c0_85, %c0_86] : memref<2x10x10x64xf32, #tpu.memory_space<vmem>>, vector<2x10x10x64xf32>
      tpu.vector_store %arg5[%c0_83, %c0_84, %c0_85, %c0_86], %68 {strides = array<i32>} : memref<2x10x10x64xf32, #tpu.memory_space<vmem>>, vector<2x10x10x64xf32>,
      %c0_87 = arith.constant 0 : index
      %c0_88 = arith.constant 0 : index
      %c0_89 = arith.constant 0 : index
      %c0_90 = arith.constant 0 : index
      %70 = vector.load %arg1[%c0_87, %c0_88, %c0_89, %c0_90] : memref<2x8x8x64xf32, #tpu.memory_space<vmem>>, vector<2x8x8x64xf32>
      %c0_91 = arith.constant 0 : index
      %c1_92 = arith.constant 1 : index
      %c1_93 = arith.constant 1 : index
      %c0_94 = arith.constant 0 : index
      %71 = vector.load %arg5[%c0_91, %c1_92, %c1_93, %c0_94] : memref<2x10x10x64xf32, #tpu.memory_space<vmem>>, vector<2x8x8x64xf32>
      tpu.vector_store %arg5[%c0_91, %c1_92, %c1_93, %c0_94], %70 {strides = array<i32>} : memref<2x10x10x64xf32, #tpu.memory_space<vmem>>, vector<2x8x8x64xf32>,
    } else {
    }
    %3 = tpu.iota {dimensions = array<i32: 2>} : vector<2x8x8x64xi32>
    %c1_i32 = arith.constant 1 : i32
    %4 = vector.broadcast %c1_i32 : i32 to vector<2x8x8x64xi32>
    %5 = arith.andi %3, %4 : vector<2x8x8x64xi32>
    %c0_i32_1 = arith.constant 0 : i32
    %6 = vector.broadcast %c0_i32_1 : i32 to vector<2x8x8x64xi32>
    %7 = arith.cmpi eq, %5, %6 : vector<2x8x8x64xi32>
    %c0 = arith.constant 0 : index
    %c1 = arith.constant 1 : index
    %c1_2 = arith.constant 1 : index
    %c0_3 = arith.constant 0 : index
    %8 = vector.load %arg5[%c0, %c1, %c1_2, %c0_3] : memref<2x10x10x64xf32, #tpu.memory_space<vmem>>, vector<2x8x8x64xf32>
    %c0_4 = arith.constant 0 : index
    %c0_5 = arith.constant 0 : index
    %c1_6 = arith.constant 1 : index
    %c0_7 = arith.constant 0 : index
    %9 = vector.load %arg5[%c0_4, %c0_5, %c1_6, %c0_7] : memref<2x10x10x64xf32, #tpu.memory_space<vmem>>, vector<2x8x8x64xf32>
    %c0_8 = arith.constant 0 : index
    %c2 = arith.constant 2 : index
    %c1_9 = arith.constant 1 : index
    %c0_10 = arith.constant 0 : index
    %10 = vector.load %arg5[%c0_8, %c2, %c1_9, %c0_10] : memref<2x10x10x64xf32, #tpu.memory_space<vmem>>, vector<2x8x8x64xf32>
    %c0_11 = arith.constant 0 : index
    %c0_12 = arith.constant 0 : index
    %c0_13 = arith.constant 0 : index
    %c0_14 = arith.constant 0 : index
    %11 = vector.load %arg5[%c0_11, %c0_12, %c0_13, %c0_14] : memref<2x10x10x64xf32, #tpu.memory_space<vmem>>, vector<2x8x8x64xf32>
    %c0_15 = arith.constant 0 : index
    %c1_16 = arith.constant 1 : index
    %c0_17 = arith.constant 0 : index
    %c0_18 = arith.constant 0 : index
    %12 = vector.load %arg5[%c0_15, %c1_16, %c0_17, %c0_18] : memref<2x10x10x64xf32, #tpu.memory_space<vmem>>, vector<2x8x8x64xf32>
    %13 = arith.select %7, %11, %12 : vector<2x8x8x64xi1>, vector<2x8x8x64xf32>
    %c0_19 = arith.constant 0 : index
    %c1_20 = arith.constant 1 : index
    %c0_21 = arith.constant 0 : index
    %c0_22 = arith.constant 0 : index
    %14 = vector.load %arg5[%c0_19, %c1_20, %c0_21, %c0_22] : memref<2x10x10x64xf32, #tpu.memory_space<vmem>>, vector<2x8x8x64xf32>
    %c0_23 = arith.constant 0 : index
    %c2_24 = arith.constant 2 : index
    %c0_25 = arith.constant 0 : index
    %c0_26 = arith.constant 0 : index
    %15 = vector.load %arg5[%c0_23, %c2_24, %c0_25, %c0_26] : memref<2x10x10x64xf32, #tpu.memory_space<vmem>>, vector<2x8x8x64xf32>
    %16 = arith.select %7, %14, %15 : vector<2x8x8x64xi1>, vector<2x8x8x64xf32>
    %c0_27 = arith.constant 0 : index
    %c0_28 = arith.constant 0 : index
    %c2_29 = arith.constant 2 : index
    %c0_30 = arith.constant 0 : index
    %17 = vector.load %arg5[%c0_27, %c0_28, %c2_29, %c0_30] : memref<2x10x10x64xf32, #tpu.memory_space<vmem>>, vector<2x8x8x64xf32>
    %c0_31 = arith.constant 0 : index
    %c1_32 = arith.constant 1 : index
    %c2_33 = arith.constant 2 : index
    %c0_34 = arith.constant 0 : index
    %18 = vector.load %arg5[%c0_31, %c1_32, %c2_33, %c0_34] : memref<2x10x10x64xf32, #tpu.memory_space<vmem>>, vector<2x8x8x64xf32>
    %19 = arith.select %7, %17, %18 : vector<2x8x8x64xi1>, vector<2x8x8x64xf32>
    %c0_35 = arith.constant 0 : index
    %c1_36 = arith.constant 1 : index
    %c2_37 = arith.constant 2 : index
    %c0_38 = arith.constant 0 : index
    %20 = vector.load %arg5[%c0_35, %c1_36, %c2_37, %c0_38] : memref<2x10x10x64xf32, #tpu.memory_space<vmem>>, vector<2x8x8x64xf32>
    %c0_39 = arith.constant 0 : index
    %c2_40 = arith.constant 2 : index
    %c2_41 = arith.constant 2 : index
    %c0_42 = arith.constant 0 : index
    %21 = vector.load %arg5[%c0_39, %c2_40, %c2_41, %c0_42] : memref<2x10x10x64xf32, #tpu.memory_space<vmem>>, vector<2x8x8x64xf32>
    %22 = arith.select %7, %20, %21 : vector<2x8x8x64xi1>, vector<2x8x8x64xf32>
    %23 = vector.shape_cast %8 : vector<2x8x8x64xf32> to vector<128x64xf32>
    %c0_43 = arith.constant 0 : index
    %c0_44 = arith.constant 0 : index
    %c0_45 = arith.constant 0 : index
    %c0_46 = arith.constant 0 : index
    %24 = vector.load %arg2[%c0_43, %c0_44, %c0_45, %c0_46] : memref<1x7x64x64xf32, #tpu.memory_space<vmem>>, vector<1x1x64x64xf32>
    %25 = vector.shape_cast %24 : vector<1x1x64x64xf32> to vector<64x64xf32>
    %cst = arith.constant dense<0.000000e+00> : vector<128x64xf32>
    %26 = tpu.matmul %23, %25, %cst {dimension_numbers = #tpu.dot_dimension_numbers<[1], [0], [0], [1], [0, 0, 1, 1], [], []>} : vector<128x64xf32>, vector<64x64xf32>, vector<128x64xf32> -> vector<128x64xf32>
    %27 = vector.shape_cast %9 : vector<2x8x8x64xf32> to vector<128x64xf32>
    %c0_47 = arith.constant 0 : index
    %c1_48 = arith.constant 1 : index
    %c0_49 = arith.constant 0 : index
    %c0_50 = arith.constant 0 : index
    %28 = vector.load %arg2[%c0_47, %c1_48, %c0_49, %c0_50] : memref<1x7x64x64xf32, #tpu.memory_space<vmem>>, vector<1x1x64x64xf32>
    %29 = vector.shape_cast %28 : vector<1x1x64x64xf32> to vector<64x64xf32>
    %cst_51 = arith.constant dense<0.000000e+00> : vector<128x64xf32>
    %30 = tpu.matmul %27, %29, %cst_51 {dimension_numbers = #tpu.dot_dimension_numbers<[1], [0], [0], [1], [0, 0, 1, 1], [], []>} : vector<128x64xf32>, vector<64x64xf32>, vector<128x64xf32> -> vector<128x64xf32>
    %31 = arith.addf %26, %30 : vector<128x64xf32>
    %32 = vector.shape_cast %10 : vector<2x8x8x64xf32> to vector<128x64xf32>
    %c0_52 = arith.constant 0 : index
    %c2_53 = arith.constant 2 : index
    %c0_54 = arith.constant 0 : index
    %c0_55 = arith.constant 0 : index
    %33 = vector.load %arg2[%c0_52, %c2_53, %c0_54, %c0_55] : memref<1x7x64x64xf32, #tpu.memory_space<vmem>>, vector<1x1x64x64xf32>
    %34 = vector.shape_cast %33 : vector<1x1x64x64xf32> to vector<64x64xf32>
    %cst_56 = arith.constant dense<0.000000e+00> : vector<128x64xf32>
    %35 = tpu.matmul %32, %34, %cst_56 {dimension_numbers = #tpu.dot_dimension_numbers<[1], [0], [0], [1], [0, 0, 1, 1], [], []>} : vector<128x64xf32>, vector<64x64xf32>, vector<128x64xf32> -> vector<128x64xf32>
    %36 = arith.addf %31, %35 : vector<128x64xf32>
    %37 = vector.shape_cast %13 : vector<2x8x8x64xf32> to vector<128x64xf32>
    %c0_57 = arith.constant 0 : index
    %c3 = arith.constant 3 : index
    %c0_58 = arith.constant 0 : index
    %c0_59 = arith.constant 0 : index
    %38 = vector.load %arg2[%c0_57, %c3, %c0_58, %c0_59] : memref<1x7x64x64xf32, #tpu.memory_space<vmem>>, vector<1x1x64x64xf32>
    %39 = vector.shape_cast %38 : vector<1x1x64x64xf32> to vector<64x64xf32>
    %cst_60 = arith.constant dense<0.000000e+00> : vector<128x64xf32>
    %40 = tpu.matmul %37, %39, %cst_60 {dimension_numbers = #tpu.dot_dimension_numbers<[1], [0], [0], [1], [0, 0, 1, 1], [], []>} : vector<128x64xf32>, vector<64x64xf32>, vector<128x64xf32> -> vector<128x64xf32>
    %41 = arith.addf %36, %40 : vector<128x64xf32>
    %42 = vector.shape_cast %16 : vector<2x8x8x64xf32> to vector<128x64xf32>
    %c0_61 = arith.constant 0 : index
    %c4 = arith.constant 4 : index
    %c0_62 = arith.constant 0 : index
    %c0_63 = arith.constant 0 : index
    %43 = vector.load %arg2[%c0_61, %c4, %c0_62, %c0_63] : memref<1x7x64x64xf32, #tpu.memory_space<vmem>>, vector<1x1x64x64xf32>
    %44 = vector.shape_cast %43 : vector<1x1x64x64xf32> to vector<64x64xf32>
    %cst_64 = arith.constant dense<0.000000e+00> : vector<128x64xf32>
    %45 = tpu.matmul %42, %44, %cst_64 {dimension_numbers = #tpu.dot_dimension_numbers<[1], [0], [0], [1], [0, 0, 1, 1], [], []>} : vector<128x64xf32>, vector<64x64xf32>, vector<128x64xf32> -> vector<128x64xf32>
    %46 = arith.addf %41, %45 : vector<128x64xf32>
    %47 = vector.shape_cast %19 : vector<2x8x8x64xf32> to vector<128x64xf32>
    %c0_65 = arith.constant 0 : index
    %c5 = arith.constant 5 : index
    %c0_66 = arith.constant 0 : index
    %c0_67 = arith.constant 0 : index
    %48 = vector.load %arg2[%c0_65, %c5, %c0_66, %c0_67] : memref<1x7x64x64xf32, #tpu.memory_space<vmem>>, vector<1x1x64x64xf32>
    %49 = vector.shape_cast %48 : vector<1x1x64x64xf32> to vector<64x64xf32>
    %cst_68 = arith.constant dense<0.000000e+00> : vector<128x64xf32>
    %50 = tpu.matmul %47, %49, %cst_68 {dimension_numbers = #tpu.dot_dimension_numbers<[1], [0], [0], [1], [0, 0, 1, 1], [], []>} : vector<128x64xf32>, vector<64x64xf32>, vector<128x64xf32> -> vector<128x64xf32>
    %51 = arith.addf %46, %50 : vector<128x64xf32>
    %52 = vector.shape_cast %22 : vector<2x8x8x64xf32> to vector<128x64xf32>
    %c0_69 = arith.constant 0 : index
    %c6 = arith.constant 6 : index
    %c0_70 = arith.constant 0 : index
    %c0_71 = arith.constant 0 : index
    %53 = vector.load %arg2[%c0_69, %c6, %c0_70, %c0_71] : memref<1x7x64x64xf32, #tpu.memory_space<vmem>>, vector<1x1x64x64xf32>
    %54 = vector.shape_cast %53 : vector<1x1x64x64xf32> to vector<64x64xf32>
    %cst_72 = arith.constant dense<0.000000e+00> : vector<128x64xf32>
    %55 = tpu.matmul %52, %54, %cst_72 {dimension_numbers = #tpu.dot_dimension_numbers<[1], [0], [0], [1], [0, 0, 1, 1], [], []>} : vector<128x64xf32>, vector<64x64xf32>, vector<128x64xf32> -> vector<128x64xf32>
    %56 = arith.addf %51, %55 : vector<128x64xf32>
    %c0_73 = arith.constant 0 : index
    %c0_74 = arith.constant 0 : index
    %c0_75 = arith.constant 0 : index
    %57 = vector.load %arg3[%c0_73, %c0_74, %c0_75] : memref<1x1x64xf32, #tpu.memory_space<vmem>>, vector<1x1x64xf32>
    %58 = vector.shape_cast %57 : vector<1x1x64xf32> to vector<1x64xf32>
    %59 = vector.broadcast %58 : vector<1x64xf32> to vector<128x64xf32>
    %60 = arith.addf %56, %59 : vector<128x64xf32>
    %cst_76 = arith.constant 0.000000e+00 : f32
    %61 = vector.broadcast %cst_76 : f32 to vector<128x64xf32>
    %62 = arith.maximumf %60, %61 : vector<128x64xf32>
    %63 = vector.shape_cast %62 : vector<128x64xf32> to vector<2x8x8x64xf32>
    %c0_77 = arith.constant 0 : index
    %c1_78 = arith.constant 1 : index
    %c1_79 = arith.constant 1 : index
    %c0_80 = arith.constant 0 : index
    %64 = vector.load %arg5[%c0_77, %c1_78, %c1_79, %c0_80] : memref<2x10x10x64xf32, #tpu.memory_space<vmem>>, vector<2x8x8x64xf32>
    tpu.vector_store %arg5[%c0_77, %c1_78, %c1_79, %c0_80], %63 {strides = array<i32>} : memref<2x10x10x64xf32, #tpu.memory_space<vmem>>, vector<2x8x8x64xf32>,
    %c7_i32 = arith.constant 7 : i32
    %65 = arith.cmpi eq, %arg0, %c7_i32 : i32
    %66 = arith.extui %65 : i1 to i32
    %c0_i32_81 = arith.constant 0 : i32
    %67 = arith.cmpi ne, %66, %c0_i32_81 : i32
    scf.if %67 {
      %c0_82 = arith.constant 0 : index
      %c0_83 = arith.constant 0 : index
      %c0_84 = arith.constant 0 : index
      %c0_85 = arith.constant 0 : index
      %68 = vector.load %arg4[%c0_82, %c0_83, %c0_84, %c0_85] : memref<2x8x8x64xf32, #tpu.memory_space<vmem>>, vector<2x8x8x64xf32>
      tpu.vector_store %arg4[%c0_82, %c0_83, %c0_84, %c0_85], %63 {strides = array<i32>} : memref<2x8x8x64xf32, #tpu.memory_space<vmem>>, vector<2x8x8x64xf32>,
    } else {
    }
    return
  }
  func.func @transform_0(%arg0: i32) -> (i32, i32, i32, i32) {
    %c0_i32 = arith.constant 0 : i32
    %c0_i32_0 = arith.constant 0 : i32
    %c0_i32_1 = arith.constant 0 : i32
    %c0_i32_2 = arith.constant 0 : i32
    %c0_i32_3 = arith.constant 0 : i32
    return %c0_i32, %c0_i32_0, %c0_i32_1, %c0_i32_2 : i32, i32, i32, i32
  }
  func.func @transform_1(%arg0: i32) -> (i32, i32, i32, i32) {
    %c0_i32 = arith.constant 0 : i32
    %c0_i32_0 = arith.constant 0 : i32
    %c0_i32_1 = arith.constant 0 : i32
    %c0_i32_2 = arith.constant 0 : i32
    return %arg0, %c0_i32, %c0_i32_0, %c0_i32_1 : i32, i32, i32, i32
  }
  func.func @transform_2(%arg0: i32) -> (i32, i32, i32) {
    %c0_i32 = arith.constant 0 : i32
    %c0_i32_0 = arith.constant 0 : i32
    %c0_i32_1 = arith.constant 0 : i32
    return %arg0, %c0_i32, %c0_i32_0 : i32, i32, i32
  }
  func.func @transform_3(%arg0: i32) -> (i32, i32, i32, i32) {
    %c0_i32 = arith.constant 0 : i32
    %c0_i32_0 = arith.constant 0 : i32
    %c0_i32_1 = arith.constant 0 : i32
    %c0_i32_2 = arith.constant 0 : i32
    %c0_i32_3 = arith.constant 0 : i32
    return %c0_i32, %c0_i32_0, %c0_i32_1, %c0_i32_2 : i32, i32, i32, i32
  }
}

module attributes {stable_mosaic.version = 11 : i64} {
  func.func @_linear_relu_kernel(%arg0: i32, %arg1: i32, %arg2: memref<2x1024xf32, #tpu.memory_space<vmem>>, %arg3: memref<1024x256xbf16, #tpu.memory_space<vmem>>, %arg4: memref<1x256xf32, #tpu.memory_space<vmem>>, %arg5: memref<2x256xf32, #tpu.memory_space<vmem>>, %arg6: memref<2x256xf32, #tpu.memory_space<vmem>>) attributes {dimension_semantics = [#tpu.dimension_semantics<parallel>, #tpu.dimension_semantics<arbitrary>], iteration_bounds = array<i64: 2, 4>, scalar_prefetch = 0 : i64, scratch_operands = 1 : i64, tpu.core_type = #tpu.core_type<tc>, window_params = [{transform_indices = @transform_0, window_bounds = array<i64: 2, 1024>}, {transform_indices = @transform_1, window_bounds = array<i64: 1024, 256>}, {transform_indices = @transform_2, window_bounds = array<i64: 1, 256>}, {transform_indices = @transform_3, window_bounds = array<i64: 2, 256>}]} {
    %c0_i32 = arith.constant 0 : i32
    %0 = arith.cmpi eq, %arg1, %c0_i32 : i32
    %1 = arith.extui %0 : i1 to i32
    %c0_i32_0 = arith.constant 0 : i32
    %2 = arith.cmpi ne, %1, %c0_i32_0 : i32
    scf.if %2 {
      %cst_9 = arith.constant 0.000000e+00 : f32
      %13 = vector.broadcast %cst_9 : f32 to vector<2x256xf32>
      %c0_10 = arith.constant 0 : index
      %c0_11 = arith.constant 0 : index
      %14 = vector.load %arg6[%c0_10, %c0_11] : memref<2x256xf32, #tpu.memory_space<vmem>>, vector<2x256xf32>
      tpu.vector_store %arg6[%c0_10, %c0_11], %13 {strides = array<i32>} : memref<2x256xf32, #tpu.memory_space<vmem>>, vector<2x256xf32>,
    } else {
    }
    %c0 = arith.constant 0 : index
    %c0_1 = arith.constant 0 : index
    %3 = vector.load %arg6[%c0, %c0_1] : memref<2x256xf32, #tpu.memory_space<vmem>>, vector<2x256xf32>
    %c0_2 = arith.constant 0 : index
    %c0_3 = arith.constant 0 : index
    %4 = vector.load %arg2[%c0_2, %c0_3] : memref<2x1024xf32, #tpu.memory_space<vmem>>, vector<2x1024xf32>
    %5 = arith.truncf %4 : vector<2x1024xf32> to vector<2x1024xbf16>
    %c0_4 = arith.constant 0 : index
    %c0_5 = arith.constant 0 : index
    %6 = vector.load %arg3[%c0_4, %c0_5] : memref<1024x256xbf16, #tpu.memory_space<vmem>>, vector<1024x256xbf16>
    %cst = arith.constant dense<0.000000e+00> : vector<2x256xf32>
    %7 = tpu.matmul %5, %6, %cst {dimension_numbers = #tpu.dot_dimension_numbers<[1], [0], [0], [1], [0, 0, 1, 1], [], []>} : vector<2x1024xbf16>, vector<1024x256xbf16>, vector<2x256xf32> -> vector<2x256xf32>
    %8 = arith.addf %3, %7 : vector<2x256xf32>
    %c0_6 = arith.constant 0 : index
    %c0_7 = arith.constant 0 : index
    %9 = vector.load %arg6[%c0_6, %c0_7] : memref<2x256xf32, #tpu.memory_space<vmem>>, vector<2x256xf32>
    tpu.vector_store %arg6[%c0_6, %c0_7], %8 {strides = array<i32>} : memref<2x256xf32, #tpu.memory_space<vmem>>, vector<2x256xf32>,
    %c3_i32 = arith.constant 3 : i32
    %10 = arith.cmpi eq, %arg1, %c3_i32 : i32
    %11 = arith.extui %10 : i1 to i32
    %c0_i32_8 = arith.constant 0 : i32
    %12 = arith.cmpi ne, %11, %c0_i32_8 : i32
    scf.if %12 {
      %c0_9 = arith.constant 0 : index
      %c0_10 = arith.constant 0 : index
      %13 = vector.load %arg6[%c0_9, %c0_10] : memref<2x256xf32, #tpu.memory_space<vmem>>, vector<2x256xf32>
      %c0_11 = arith.constant 0 : index
      %c0_12 = arith.constant 0 : index
      %14 = vector.load %arg4[%c0_11, %c0_12] : memref<1x256xf32, #tpu.memory_space<vmem>>, vector<1x256xf32>
      %15 = vector.broadcast %14 : vector<1x256xf32> to vector<2x256xf32>
      %16 = arith.addf %13, %15 : vector<2x256xf32>
      %cst_13 = arith.constant 0.000000e+00 : f32
      %17 = vector.broadcast %cst_13 : f32 to vector<2x256xf32>
      %18 = arith.maximumf %16, %17 : vector<2x256xf32>
      %c0_14 = arith.constant 0 : index
      %c0_15 = arith.constant 0 : index
      %19 = vector.load %arg5[%c0_14, %c0_15] : memref<2x256xf32, #tpu.memory_space<vmem>>, vector<2x256xf32>
      tpu.vector_store %arg5[%c0_14, %c0_15], %18 {strides = array<i32>} : memref<2x256xf32, #tpu.memory_space<vmem>>, vector<2x256xf32>,
    } else {
    }
    return
  }
  func.func @transform_0(%arg0: i32, %arg1: i32) -> (i32, i32) {
    %c0_i32 = arith.constant 0 : i32
    %c0_i32_0 = arith.constant 0 : i32
    return %c0_i32, %arg1 : i32, i32
  }
  func.func @transform_1(%arg0: i32, %arg1: i32) -> (i32, i32) {
    %c0_i32 = arith.constant 0 : i32
    return %arg1, %arg0 : i32, i32
  }
  func.func @transform_2(%arg0: i32, %arg1: i32) -> (i32, i32) {
    %c0_i32 = arith.constant 0 : i32
    %c0_i32_0 = arith.constant 0 : i32
    return %c0_i32, %arg0 : i32, i32
  }
  func.func @transform_3(%arg0: i32, %arg1: i32) -> (i32, i32) {
    %c0_i32 = arith.constant 0 : i32
    %c0_i32_0 = arith.constant 0 : i32
    return %c0_i32, %arg0 : i32, i32
  }
}

</mosaic_0001>

<bundles_post_ra>
// kernel: forward.3
= control target key start
LH: loop header
LB: loop body
LE: loop exit
PB: predicated region body
PF: predicated region fallthrough
CT: control target
= control target key end

     0   :  { %s2512_s0 = inlined_call_operand.vmem [shape: f32[2,4096], index: 0, kind: input, shape index: {}]   ;;  %s2513_s1 = inlined_call_operand.hbm [shape: bf16[4096,512], index: 1, kind: input, shape index: {}]   ;;  %s2514_s2 = inlined_call_operand.hbm [shape: f32[1,512], index: 2, kind: input, shape index: {}]   ;;  %s2515_s3 = inlined_call_operand.hbm [shape: f32[2,512], index: 3, kind: output, shape index: {}]  }
   0x1   :  { %2520 = sst [smem:[#allocation15_spill]] %s2513_s1 }
   0x2   :  { %8 = vsyncpa [#allocation4], 0 }
   0x3   :  { %10 = vsyncpa [#allocation4 + $0x1], 0 }
   0x4   :  { %11 = vsyncpa [#allocation7], 0 }
   0x5   :  { %13 = vsyncpa [#allocation7 + $0x1], 0 }
   0x6   :  { %14 = vsyncpa [#allocation5], 0 }
   0x7   :  { %16 = vsyncpa [#allocation5 + $0x1], 0  ;;  %s2108_s12 = smov 0   ;;  %s2110_s13 = smov 0  }
   0x8   :  { %s2112_s14 = smov 0   ;;  %s2114_s15 = smov 0  }
   0x9   :  { %s2116_s16 = smov 0   ;;  %s2118_s17 = smov 0  }
   0xa   :  { %s2120_s18 = smov 0   ;;  %s2122_s19 = smov 0  }
   0xb   :  { %s2124_s20 = smov 0   ;;  %s2126_s21 = smov 0  }
   0xc   :  { %s2128_s22 = smov 0  }
   0xd LB: > { %2521 = sst [smem:[#allocation12_spill]] %s2074_s21  ;;  %s31_s23 = sadd.s32 1, %s2070_s20  ;;  %s2078_s22 = sphi %s2128_s22, %s22_s22   ;;  %s2074_s21 = sphi %s2126_s21, %s2538_s21   ;;  %s2070_s20 = sphi %s2124_s20, %s2546_s20   ;;  %s2066_s19 = sphi %s2122_s19, %s2536_s19   ;;  %s2062_s18 = sphi %s2120_s18, %s2545_s18   ;;  %s2058_s17 = sphi %s2118_s17, %s2544_s17   ;;  %s2054_s16 = sphi %s2116_s16, %s2543_s16   ;;  %s2050_s15 = sphi %s2114_s15, %s2542_s15   ;;  %s2046_s14 = sphi %s2112_s14, %s2541_s14   ;;  %s2042_s13 = sphi %s2110_s13, %s2540_s13   ;;  %s2038_s12 = sphi %s2108_s12, %s2539_s12  }
   0xe   : > { %p2164_p0 = scmp.ge.s32.totalorder %s31_s23, 4  ;;  %p76_p1 = scmp.ne.s32.totalorder %s2058_s17, %s2054_s16 }
   0xf   : > { %p77_p2 = scmp.eq.s32.totalorder %s2078_s22, 0  ;;  %p1609_p4 = scmp.lt.s32.totalorder %s2078_s22, 8 }
  0x10   : > { %s2548_s23 = smov (%p2164_p0, %s31_s23), 0  ;;  %s167_s26 = sand.u32 1, %s2058_s17  }
  0x11   : > { %2523 = sst [smem:[#allocation13_spill]] %s2548_s23  ;;  %p78_p3 = por %p77_p2, %p76_p1 }
  0x12   : > { %s1440_s27 = sshll.u32 %s167_s26, 10  ;;  %s1442_s28 = sshll.u32 %s2074_s21, 1 }
  0x13   : > { %s1589_s29 = sshll.u32 %s2070_s20, 9  ;;  %s171_s30 = scalar_lea.vmem [#allocation3], %s1440_s27 }
  0x14   : > { %s181_s4 = sshll.u32 %s171_s30, 4  ;;  %s178_s5 = sadd.s32 %s1589_s29, %s1442_s28  ;;  %s182_s4 = int_to_ptr.vmem [resolvable:$true] %s181_s4 }
  0x15   : > { %s1444_s6 = sshll.u32 %s178_s5, 6  ;;  %p2184_p5 = pnand %p1609_p4, %p78_p3 }
  0x16   : > { %s2525_s1 = sld [smem:[#allocation15_spill]]  ;;  %p1448_p6 = scmp.ge.s32.totalorder %s2078_s22, 1 }
  0x17   : > { %s168_s11 = scalar_lea.sflag [#allocation4], %s167_s26  ;;  %p1900_p7 = pneg %p2184_p5 }
  0x18   : > { %s1911_s25 = scalar_lea.vmem %s182_s4, 16384  ;;  %s2080_s27 = smov [#allocation3]  }
  0x19   : > { %p1912_p8 = scmp.ne.s32.totalorder %s182_s4, %s1911_s25  ;;  %s1916_s28 = sshll.u32 %s2080_s27, 4  ;;  %s1917_s28 = int_to_ptr.vmem [resolvable:$false] %s1916_s28 }
  0x1a   : > { %s1918_s29 = scalar_lea.vmem %s1917_s28, 32768  ;;  %p1919_p11 = scmp.lt.s32.totalorder %s182_s4, %s1917_s28 }
  0x1b   : > { %p1914_p9 = pnand %p1912_p8, %p1900_p7  ;;  %p1920_p12 = scmp.lt.s32.totalorder %s1918_s29, %s1911_s25 }
  0x1c   : > { %s180_s10 = scalar_lea.hbm %s2525_s1, %s1444_s6 }
  0x1d   : > { %p1915_p10 = pneg %p1914_p9  ;;  %p1921_p13 = por %p1920_p12, %p1919_p11 }
  0x1f   : > { %p1922_p1 = pnand %p1921_p13, %p1915_p10 }
  0x21   : > { %1925 = shalt.err (!%p1922_p1)
}
  0x22   : > { %s2081_s30 = smov 256   ;;  %s2082_s25 = smov 128  }
  0x23   : > { %s2083_s26 = smov 8   ;;  %p208_p3 = scmp.lt.s32.totalorder %s2078_s22, 9 }
  0x24   : > { %1601 = dma.hbm_to_vmem [thread:$0]  (!%p2184_p5), %s180_s10, 16384, %s182_s4, %s168_s11, %s2081_s30, %s2082_s25, %s2083_s26  }
  0x25   : > { %p2199_p7 = pnand %p1448_p6, %p208_p3  ;;  %s64_s6 = ssub.s32 %s2070_s20, %s2548_s23 }
  0x26   : > { %s1436_s8 = sadd.s32 4294967295, %s2078_s22   ;;  %s34_s9 = sadd.s32 1, %s2074_s21 }
  0x27   : > { %p82_p8 = scmp.ne.s32.totalorder %s2054_s16, %s2050_s15  ;;  %s2550_s9 = smov (!%p2164_p0, %s34_s9), %s2074_s21 }
  0x28   : > { %s1437_s7 = sadd.s32 4294967294, %s2078_s22   ;;  %p83_p5 = scmp.eq.s32.totalorder %s1436_s8, 0 }
  0x29   : > { %p36_p9 = scmp.ge.s32.totalorder %s2550_s9, 2  ;;  %s95_s4 = sadd.s32 1, %s2046_s14 }
  0x2a   : > { %p2214_p10 = por %p83_p5, %p82_p8  ;;  %p108_p6 = scmp.ne.s32.totalorder %s2042_s13, %s2038_s12 }
  0x2b   : > { %s2552_s9 = smov (%p36_p9, %s2550_s9), 0  ;;  %p102_p0 = scmp.ne.s32.totalorder %s2046_s14, %s2042_s13 }
  0x2c   : > { %2528 = sst [smem:[#allocation14_spill]] %s2552_s9  ;;  %p2227_p11 = por %p108_p6, %p83_p5 }
  0x2d   : > { %s65_s24 = ssub.s32 %s2074_s21, %s2552_s9  ;;  %p132_p12 = scmp.eq.s32.totalorder %s1436_s8, 7 }
  0x2e   : > { %s66_s11 = sor.u32 %s65_s24, %s64_s6  ;;  %p93_p13 = scmp.eq.s32.totalorder %s65_s24, 0 }
  0x2f   : > { %p67_p1 = scmp.eq.s32.totalorder %s66_s11, 0  ;;  %p2233_p3 = por %p132_p12, %p102_p0 }
  0x30   : > { %s2238_s28 = scalar_select %p93_p13, %s2046_s14, %s95_s4  }
  0x31   : > { %s2530_s27 = scalar_select %p2233_p3, 1, 0 }
  0x32   : > { %s2531_s29 = sadd.s32 1, %s2058_s17  ;;  %p138_p8 = scmp.eq.s32.totalorder %s1437_s7, 7 }
  0x33   : > { %s2243_s30 = scalar_select %p67_p1, %s2058_s17, %s2531_s29  }
  0x34   : > { %s191_s25 = sand.u32 1, %s2046_s14   ;;  %p104_p5 = por %p102_p0, %p77_p2 }
  0x35   : > { %s1445_s26 = sshll.u32 %s191_s25, 1  ;;  %p2251_p9 = por %p138_p8, %p108_p6 }
  0x36   : > { %s1590_s8 = sshll.u32 %s2074_s21, 5  ;;  %s195_s24 = scalar_lea.vmem [#allocation6], %s1445_s26 }
  0x37   : > { %s2532_s6 = scalar_select %p2251_p9, 1, 0 }
  0x38   : > { %s203_s11 = sshll.u32 %s195_s24, 4  ;;  %s201_s4 = scalar_lea.hbm %s2514_s2, %s1590_s8  ;;  %s204_s11 = int_to_ptr.vmem [resolvable:$true] %s203_s11 }
  0x39   : > { %p2261_p12 = pnand %p1609_p4, %p104_p5  ;;  %s192_s29 = scalar_lea.sflag [#allocation7], %s191_s25 }
  0x3a   : > { %s1939_s23 = scalar_lea.vmem %s204_s11, 32  ;;  %s2084_s26 = smov [#allocation6]  }
  0x3b   : > { %p1928_p2 = pneg %p2261_p12  ;;  %p1940_p6 = scmp.ne.s32.totalorder %s204_s11, %s1939_s23 }
  0x3c   : > { %s1944_s24 = sshll.u32 %s2084_s26, 4  ;;  %s1945_s24 = int_to_ptr.vmem [resolvable:$false] %s1944_s24 }
  0x3d   : > { %p1942_p0 = pnand %p1940_p6, %p1928_p2  ;;  %s1946_s21 = scalar_lea.vmem %s1945_s24, 64 }
  0x3e   : > { %p1947_p1 = scmp.lt.s32.totalorder %s204_s11, %s1945_s24  ;;  %p1948_p8 = scmp.lt.s32.totalorder %s1946_s21, %s1939_s23 }
  0x3f   : > { %p1943_p13 = pneg %p1942_p0 }
  0x40   : > { %p1949_p9 = por %p1948_p8, %p1947_p1 }
  0x42   : > { %p1950_p3 = pnand %p1949_p9, %p1943_p13 }
  0x44   : > { %1953 = shalt.err (!%p1950_p3)
}
  0x45   : > { %1604 = dma.hbm_to_vmem [thread:$0]  (!%p2261_p12), %s201_s4, 32, %s204_s11, %s192_s29  }
  0x46   : > { %212 = sbr.rel (%p2199_p7) target bundleno = 463 (0x1cf), region = 32  ;;  %s214_s1 = sand.u32 (!%p2199_p7), 1, %s2054_s16  }
  0x47   : > { %s1449_s9 = sshll.u32 (!%p2199_p7), %s214_s1, 10  ;;  %s215_s25 = scalar_lea.sflag (!%p2199_p7), [#allocation4], %s214_s1 }
  0x48   : > { %s2272_s8 = scalar_lea.vmem (!%p2199_p7), [#allocation3], %s1449_s9 }
  0x4b   : > { %2025 = dma.done.wait (%p2214_p10), %s215_s25, 16384  }
  0x4c   : > { %2027 = vsyncadd (%p2214_p10), %s215_s25, 4294950912  ;;  %s2279_s21 = sand.u32 1, %s2042_s13  }
  0x4d   : > { %s1450_s23 = sshll.u32 %s2279_s21, 1  ;;  %s224_s5 = scalar_lea.sflag [#allocation7], %s2279_s21 }
  0x4e   : > { %s2283_s11 = scalar_lea.vmem [#allocation6], %s1450_s23 }
  0x4f   : > { %2029 = dma.done.wait (%p2227_p11), %s224_s5, 32  }
  0x50   : > { %2031 = vsyncadd (%p2227_p11), %s224_s5, 4294967264  ;;  %s1451_s4 = sshll.u32 %s2279_s21, 2  ;;  %s1452_s10 = sshll.u32 %s2062_s18, 3 }
  0x51   : > { %p261_p4 = scmp.lt.s32.totalorder %s1452_s10, 31  ;;  %s2296_s1 = scalar_lea.vmem [#allocation8], %s1451_s4 }
  0x52   : > { %p1454_p7 = scmp.ne.s32.totalorder %s2062_s18, 0 }
  0x53   : > { %s2554_s10 = smov (!%p261_p4, %s1452_s10), 31 }
  0x54   : > { %s1453_s7 = sshll.u32 %s2554_s10, 1  ;;  %273 = sbr.rel (%p1454_p7) target bundleno = 91 (0x5b), region = 44 }
  0x55   : > { %s2294_s24 = scalar_lea.vmem %s2512_s0, %s1453_s7 }
  0x59   : > { %v2085_v0 = vmov 0.0  }
  0x5a   : > { %274 = vst [vmem:[#allocation2] sm:$0xf] %v2085_v0 }
  0x5b PF: > { %v1704_v1 = vld [vmem:[%s2272_s8 + $0x74] ss:$8 sps:$4 sm:$0xff]   ;;  %v1708_v3 = vld [vmem:[%s2272_s8 + $0x70] ss:$8 sps:$4 sm:$0xff]   ;;  %v1710_v5 = vld [vmem:[%s2272_s8 + $0x64] ss:$8 sps:$4 sm:$0xff]   ;;  %v284_v39 = vlaneseq }
  0x5c   : > { %v1706_v2 = vld [vmem:[%s2272_s8 + $0x174] ss:$8 sps:$4 sm:$0xff]   ;;  %1098 = vmatprep.subr.bf16.mxu0 %v1704_v1  ;;  %v1709_v4 = vld [vmem:[%s2272_s8 + $0x170] ss:$8 sps:$4 sm:$0xff]   ;;  %v1712_v6 = vld [vmem:[%s2272_s8 + $0x164] ss:$8 sps:$4 sm:$0xff]  }
  0x5d   : > { %1139 = vmatprep.subr.bf16.mxu1 %v1706_v2  ;;  %1099 = vmatpush1.bf16.msra.mxu0 %v1708_v3  ;;  %v1714_v7 = vld [vmem:[%s2272_s8 + $0x60] ss:$8 sps:$4 sm:$0xff]   ;;  %v1716_v9 = vld [vmem:[%s2272_s8 + $0x54] ss:$8 sps:$4 sm:$0xff]   ;;  %v1720_v11 = vld [vmem:[%s2272_s8 + $0x50] ss:$8 sps:$4 sm:$0xff]  }
  0x5e   : > { %1140 = vmatpush1.bf16.msra.mxu1 %v1709_v4  ;;  %1100 = vmatprep.subr.bf16.mxu0 %v1710_v5  ;;  %v1715_v8 = vld [vmem:[%s2272_s8 + $0x160] ss:$8 sps:$4 sm:$0xff]   ;;  %v1718_v10 = vld [vmem:[%s2272_s8 + $0x154] ss:$8 sps:$4 sm:$0xff]   ;;  %v1721_v12 = vld [vmem:[%s2272_s8 + $0x150] ss:$8 sps:$4 sm:$0xff]  }
  0x5f   : > { %1141 = vmatprep.subr.bf16.mxu1 %v1712_v6  ;;  %v1722_v13 = vld [vmem:[%s2272_s8 + $0x44] ss:$8 sps:$4 sm:$0xff]   ;;  %v1726_v15 = vld [vmem:[%s2272_s8 + $0x40] ss:$8 sps:$4 sm:$0xff]   ;;  %v1728_v17 = vld [vmem:[%s2272_s8 + $0x34] ss:$8 sps:$4 sm:$0xff]  }
  0x60   : > { %v1724_v14 = vld [vmem:[%s2272_s8 + $0x144] ss:$8 sps:$4 sm:$0xff]   ;;  %v1727_v16 = vld [vmem:[%s2272_s8 + $0x140] ss:$8 sps:$4 sm:$0xff]   ;;  %v1730_v18 = vld [vmem:[%s2272_s8 + $0x134] ss:$8 sps:$4 sm:$0xff]  }
  0x61   : > { %1101 = vmatpush1.bf16.msra.mxu0 %v1714_v7  ;;  %v1732_v19 = vld [vmem:[%s2272_s8 + $0x30] ss:$8 sps:$4 sm:$0xff]   ;;  %v1734_v21 = vld [vmem:[%s2272_s8 + $0x24] ss:$8 sps:$4 sm:$0xff]   ;;  %v1738_v23 = vld [vmem:[%s2272_s8 + $0x20] ss:$8 sps:$4 sm:$0xff]  }
  0x62   : > { %1142 = vmatpush1.bf16.msra.mxu1 %v1715_v8  ;;  %1102 = vmatprep.subr.bf16.mxu0 %v1716_v9  ;;  %v1733_v20 = vld [vmem:[%s2272_s8 + $0x130] ss:$8 sps:$4 sm:$0xff]   ;;  %v1736_v22 = vld [vmem:[%s2272_s8 + $0x124] ss:$8 sps:$4 sm:$0xff]   ;;  %v1739_v24 = vld [vmem:[%s2272_s8 + $0x120] ss:$8 sps:$4 sm:$0xff]  }
  0x63   : > { %1143 = vmatprep.subr.bf16.mxu1 %v1718_v10  ;;  %v1740_v25 = vld [vmem:[%s2272_s8 + $0x14] ss:$8 sps:$4 sm:$0xff]   ;;  %v1744_v27 = vld [vmem:[%s2272_s8 + $0x10] ss:$8 sps:$4 sm:$0xff]   ;;  %v1746_v29 = vld [vmem:[%s2272_s8 + $0x4] ss:$8 sps:$4 sm:$0xff]  }
  0x64   : > { %v1742_v26 = vld [vmem:[%s2272_s8 + $0x114] ss:$8 sps:$4 sm:$0xff]   ;;  %v1745_v28 = vld [vmem:[%s2272_s8 + $0x110] ss:$8 sps:$4 sm:$0xff]   ;;  %v1748_v30 = vld [vmem:[%s2272_s8 + $0x104] ss:$8 sps:$4 sm:$0xff]  }
  0x65   : > { %1103 = vmatpush1.bf16.msra.mxu0 %v1720_v11  ;;  %v1750_v31 = vld [vmem:[%s2272_s8] ss:$8 sps:$4 sm:$0xff]   ;;  %v1752_v33 = vld [vmem:[%s2272_s8 + $0xf4] ss:$8 sps:$4 sm:$0xff]   ;;  %v1756_v35 = vld [vmem:[%s2272_s8 + $0xf0] ss:$8 sps:$4 sm:$0xff]  }
  0x66   : > { %1144 = vmatpush1.bf16.msra.mxu1 %v1721_v12  ;;  %1104 = vmatprep.subr.bf16.mxu0 %v1722_v13  ;;  %v1751_v32 = vld [vmem:[%s2272_s8 + $0x100] ss:$8 sps:$4 sm:$0xff]   ;;  %v1754_v34 = vld [vmem:[%s2272_s8 + $0x1f4] ss:$8 sps:$4 sm:$0xff]   ;;  %v1757_v36 = vld [vmem:[%s2272_s8 + $0x1f0] ss:$8 sps:$4 sm:$0xff]  }
  0x67   : > { %1145 = vmatprep.subr.bf16.mxu1 %v1724_v14  ;;  %v2086_v37 = vmov 1983009808   ;;  %v1758_v40 = vld [vmem:[%s2272_s8 + $0xe4] ss:$8 sps:$4 sm:$0xff]   ;;  %v1762_v42 = vld [vmem:[%s2272_s8 + $0xe0] ss:$8 sps:$4 sm:$0xff]  }
  0x68   : > { %v282_v38 = vunpack.c.l.s4 %v2086_v37  ;;  %v1760_v41 = vld [vmem:[%s2272_s8 + $0x1e4] ss:$8 sps:$4 sm:$0xff]   ;;  %v2338_v44 = vshrl.u32 %v284_v39, 7  ;;  %v1763_v45 = vld [vmem:[%s2272_s8 + $0x1e0] ss:$8 sps:$4 sm:$0xff]   ;;  %p1583_p10 = scmp.ne.s32.totalorder %s2062_s18, 3 }
  0x69   : > { %1105 = vmatpush1.bf16.msra.mxu0 %v1726_v15  ;;  %v1764_v46 = vld [vmem:[%s2272_s8 + $0xd4] ss:$8 sps:$4 sm:$0xff]   ;;  %v1768_v48 = vld [vmem:[%s2272_s8 + $0xd0] ss:$8 sps:$4 sm:$0xff]   ;;  %v1770_v51 = vld [vmem:[%s2272_s8 + $0xc4] ss:$8 sps:$4 sm:$0xff]  }
  0x6a   : > { %1146 = vmatpush1.bf16.msra.mxu1 %v1727_v16  ;;  %1106 = vmatprep.subr.bf16.mxu0 %v1728_v17  ;;  %v283_v43 = vunpack.c.0.s8 %v282_v38  ;;  %v1766_v47 = vld [vmem:[%s2272_s8 + $0x1d4] ss:$8 sps:$4 sm:$0xff]   ;;  %v1769_v49 = vld [vmem:[%s2272_s8 + $0x1d0] ss:$8 sps:$4 sm:$0xff]   ;;  %v1772_v52 = vld [vmem:[%s2272_s8 + $0x1c4] ss:$8 sps:$4 sm:$0xff]  }
  0x6b   : > { %1147 = vmatprep.subr.bf16.mxu1 %v1730_v18  ;;  %v276_v53 = vld [vmem:[%s2294_s24] sm:$0xff]  ;;  %v1780_v62 = vld [vmem:[%s2272_s8 + $0xb0] ss:$8 sps:$4 sm:$0xff]   ;;  %v1782_v2 = vld [vmem:[%s2272_s8 + $0xa4] ss:$8 sps:$4 sm:$0xff]  }
  0x6c   : > { %v2346_v50 = vsub.s32 %v283_v43, %v2338_v44  ;;  %v1774_v54 = vld [vmem:[%s2272_s8 + $0xc0] ss:$8 sps:$4 sm:$0xff]   ;;  %v280_v56 = vcombine.high %v276_v53, %v276_v53  ;;  %v1776_v58 = vld [vmem:[%s2272_s8 + $0xb4] ss:$8 sps:$4 sm:$0xff]   ;;  %v1781_v1 = vld [vmem:[%s2272_s8 + $0x1b0] ss:$8 sps:$4 sm:$0xff]  }
  0x6d   : > { %1107 = vmatpush1.bf16.msra.mxu0 %v1732_v19  ;;  %v1775_v57 = vld [vmem:[%s2272_s8 + $0x1c0] ss:$8 sps:$4 sm:$0xff]   ;;  %v1778_v59 = vld [vmem:[%s2272_s8 + $0x1b4] ss:$8 sps:$4 sm:$0xff]   ;;  %v1784_v3 = vld [vmem:[%s2272_s8 + $0x1a4] ss:$8 sps:$4 sm:$0xff]  }
  0x6e   : > { %1148 = vmatpush1.bf16.msra.mxu1 %v1733_v20  ;;  %1108 = vmatprep.subr.bf16.mxu0 %v1734_v21  ;;  %v287_v55 = vrot.slane %v276_v53, %v2346_v50  ;;  %v294_v61 = vrot.slane %v280_v56, %v2346_v50  ;;  %v1786_v5 = vld [vmem:[%s2272_s8 + $0xa0] ss:$8 sps:$4 sm:$0xff]   ;;  %v1788_v7 = vld [vmem:[%s2272_s8 + $0x94] ss:$8 sps:$4 sm:$0xff]   ;;  %v1792_v9 = vld [vmem:[%s2272_s8 + $0x90] ss:$8 sps:$4 sm:$0xff]  }
  0x6f   : > { %1149 = vmatprep.subr.bf16.mxu1 %v1736_v22  ;;  %v1787_v6 = vld [vmem:[%s2272_s8 + $0x1a0] ss:$8 sps:$4 sm:$0xff]   ;;  %v1790_v8 = vld [vmem:[%s2272_s8 + $0x194] ss:$8 sps:$4 sm:$0xff]   ;;  %v1793_v10 = vld [vmem:[%s2272_s8 + $0x190] ss:$8 sps:$4 sm:$0xff]  }
  0x70   : > { %v295_v60 = vcombine.high %v287_v55, %v287_v55  ;;  %v296_v0 = vcombine.high %v294_v61, %v294_v61  ;;  %v1794_v11 = vld [vmem:[%s2272_s8 + $0x84] ss:$8 sps:$4 sm:$0xff]   ;;  %v1798_v13 = vld [vmem:[%s2272_s8 + $0x80] ss:$8 sps:$4 sm:$0xff]   ;;  %v1803_v15 = vld [vmem:[%s2272_s8 + $0x274] ss:$8 sps:$4 sm:$0xff]   ;;  %v322_v17 = vpack.c.bf16 %v287_v55, %v287_v55  ;;  %v324_v18 = vpack.c.bf16 %v294_v61, %v294_v61 }
  0x71   : > { %1109 = vmatpush1.bf16.msra.mxu0 %v1738_v23  ;;  %v1796_v12 = vld [vmem:[%s2272_s8 + $0x184] ss:$8 sps:$4 sm:$0xff]   ;;  %v1799_v14 = vld [vmem:[%s2272_s8 + $0x180] ss:$8 sps:$4 sm:$0xff]   ;;  %v1806_v16 = vld [vmem:[%s2272_s8 + $0x374] ss:$8 sps:$4 sm:$0xff]  }
  0x72   : > { %1150 = vmatpush1.bf16.msra.mxu1 %v1739_v24  ;;  %1110 = vmatprep.subr.bf16.mxu0 %v1740_v25  ;;  %v323_v63 = vpack.c.bf16 %v295_v60, %v295_v60  ;;  %v325_v4 = vpack.c.bf16 %v296_v0, %v296_v0  ;;  %v1801_v19 = vld [vmem:[%s2272_s8 + $0x270] ss:$8 sps:$4 sm:$0xff]   ;;  %v1809_v21 = vld [vmem:[%s2272_s8 + $0x264] ss:$8 sps:$4 sm:$0xff]   ;;  %v1807_v23 = vld [vmem:[%s2272_s8 + $0x260] ss:$8 sps:$4 sm:$0xff]  }
  0x73   : > { %1151 = vmatprep.subr.bf16.mxu1 %v1742_v26  ;;  %v1804_v20 = vld [vmem:[%s2272_s8 + $0x370] ss:$8 sps:$4 sm:$0xff]   ;;  %v1812_v22 = vld [vmem:[%s2272_s8 + $0x364] ss:$8 sps:$4 sm:$0xff]   ;;  %v1810_v24 = vld [vmem:[%s2272_s8 + $0x360] ss:$8 sps:$4 sm:$0xff]  }
  0x74   : > { %1130 = vmatprep.mubr.bf16.mxu0 %v323_v63  ;;  %1171 = vmatprep.mubr.bf16.mxu1 %v325_v4  ;;  %v1815_v25 = vld [vmem:[%s2272_s8 + $0x254] ss:$8 sps:$4 sm:$0xff]   ;;  %v1833_v37 = vld [vmem:[%s2272_s8 + $0x224] ss:$8 sps:$4 sm:$0xff]   ;;  %v1831_v39 = vld [vmem:[%s2272_s8 + $0x220] ss:$8 sps:$4 sm:$0xff]  }
  0x75   : > { %1111 = vmatpush1.bf16.msra.mxu0 %v1744_v27  ;;  %v1818_v26 = vld [vmem:[%s2272_s8 + $0x354] ss:$8 sps:$4 sm:$0xff]   ;;  %v1813_v27 = vld [vmem:[%s2272_s8 + $0x250] ss:$8 sps:$4 sm:$0xff]   ;;  %v1836_v38 = vld [vmem:[%s2272_s8 + $0x324] ss:$8 sps:$4 sm:$0xff]  }
  0x76   : > { %1152 = vmatpush1.bf16.msra.mxu1 %v1745_v28  ;;  %1112 = vmatprep.subr.bf16.mxu0 %v1746_v29  ;;  %v1816_v28 = vld [vmem:[%s2272_s8 + $0x350] ss:$8 sps:$4 sm:$0xff]   ;;  %v1821_v29 = vld [vmem:[%s2272_s8 + $0x244] ss:$8 sps:$4 sm:$0xff]   ;;  %v1843_v56 = vld [vmem:[%s2272_s8 + $0x200] ss:$8 sps:$4 sm:$0xff]  }
  0x77   : > { %1153 = vmatprep.subr.bf16.mxu1 %v1748_v30  ;;  %v1824_v30 = vld [vmem:[%s2272_s8 + $0x344] ss:$8 sps:$4 sm:$0xff]   ;;  %v1854_v60 = vld [vmem:[%s2272_s8 + $0x3f4] ss:$8 sps:$4 sm:$0xff]   ;;  %v1849_v61 = vld [vmem:[%s2272_s8 + $0x2f0] ss:$8 sps:$4 sm:$0xff]  }
  0x78   : > { %v277_v43 = vld [vmem:[%s2294_s24 + $0x8] sm:$0xff]  ;;  %v1866_v4 = vld [vmem:[%s2272_s8 + $0x3d4] ss:$8 sps:$4 sm:$0xff]  }
  0x79   : > { %1113 = vmatpush1.bf16.msra.mxu0 %v1750_v31  ;;  %v1819_v31 = vld [vmem:[%s2272_s8 + $0x240] ss:$8 sps:$4 sm:$0xff]   ;;  %v1848_v53 = vld [vmem:[%s2272_s8 + $0x304] ss:$8 sps:$4 sm:$0xff]  }
  0x7a   : > { %1154 = vmatpush1.bf16.msra.mxu1 %v1751_v32  ;;  %1114 = vmatprep.subr.bf16.mxu0 %v1752_v33  ;;  %v1822_v32 = vld [vmem:[%s2272_s8 + $0x340] ss:$8 sps:$4 sm:$0xff]   ;;  %v1827_v33 = vld [vmem:[%s2272_s8 + $0x234] ss:$8 sps:$4 sm:$0xff]   ;;  %v1857_v63 = vld [vmem:[%s2272_s8 + $0x2e4] ss:$8 sps:$4 sm:$0xff]  }
  0x7b   : > { %1155 = vmatprep.subr.bf16.mxu1 %v1754_v34  ;;  %v1830_v34 = vld [vmem:[%s2272_s8 + $0x334] ss:$8 sps:$4 sm:$0xff]   ;;  %v1860_v0 = vld [vmem:[%s2272_s8 + $0x3e4] ss:$8 sps:$4 sm:$0xff]  }
  0x7d   : > { %1115 = vmatpush2.bf16.msra.mxu0 %v1756_v35  ;;  %v1825_v35 = vld [vmem:[%s2272_s8 + $0x230] ss:$8 sps:$4 sm:$0xff]  }
  0x7e   : > { %1156 = vmatpush2.bf16.msra.mxu1 %v1757_v36  ;;  %1116 = vmatprep.subr.bf16.mxu0 %v1758_v40  ;;  %v1828_v36 = vld [vmem:[%s2272_s8 + $0x330] ss:$8 sps:$4 sm:$0xff]   ;;  %v1834_v40 = vld [vmem:[%s2272_s8 + $0x320] ss:$8 sps:$4 sm:$0xff]  }
  0x7f   : > { %1157 = vmatprep.subr.bf16.mxu1 %v1760_v41  ;;  %v1839_v41 = vld [vmem:[%s2272_s8 + $0x214] ss:$8 sps:$4 sm:$0xff]  }
  0x81   : > { %1117 = vmatpush2.bf16.msra.mxu0 %v1762_v42  ;;  %v1842_v42 = vld [vmem:[%s2272_s8 + $0x314] ss:$8 sps:$4 sm:$0xff]  }
  0x82   : > { %1158 = vmatpush2.bf16.msra.mxu1 %v1763_v45  ;;  %1118 = vmatprep.subr.bf16.mxu0 %v1764_v46  ;;  %v2399_v45 = vrot.slane %v277_v43, %v2346_v50  ;;  %v297_v46 = vcombine.high %v277_v43, %v277_v43 }
  0x83   : > { %1159 = vmatprep.subr.bf16.mxu1 %v1766_v47  ;;  %v1837_v47 = vld [vmem:[%s2272_s8 + $0x210] ss:$8 sps:$4 sm:$0xff]  }
  0x85   : > { %1119 = vmatpush2.bf16.msra.mxu0 %v1768_v48  ;;  %v1840_v48 = vld [vmem:[%s2272_s8 + $0x310] ss:$8 sps:$4 sm:$0xff]  }
  0x86   : > { %1160 = vmatpush2.bf16.msra.mxu1 %v1769_v49  ;;  %1120 = vmatprep.subr.bf16.mxu0 %v1770_v51  ;;  %v312_v49 = vcombine.high %v2399_v45, %v2399_v45  ;;  %v2406_v51 = vrot.slane %v297_v46, %v2346_v50 }
  0x87   : > { %1161 = vmatprep.subr.bf16.mxu1 %v1772_v52  ;;  %v1845_v52 = vld [vmem:[%s2272_s8 + $0x204] ss:$8 sps:$4 sm:$0xff]  }
  0x88   : > { %v313_v55 = vcombine.high %v2406_v51, %v2406_v51 }
  0x89   : > { %1121 = vmatpush2.bf16.msra.mxu0 %v1774_v54  ;;  %v327_v54 = vpack.c.bf16 %v312_v49, %v312_v49 }
  0x8a   : > { %1162 = vmatpush2.bf16.msra.mxu1 %v1775_v57  ;;  %1122 = vmatprep.subr.bf16.mxu0 %v1776_v58  ;;  %v1846_v57 = vld [vmem:[%s2272_s8 + $0x300] ss:$8 sps:$4 sm:$0xff]   ;;  %v329_v58 = vpack.c.bf16 %v313_v55, %v313_v55 }
  0x8b   : > { %1163 = vmatprep.subr.bf16.mxu1 %v1778_v59  ;;  %v1851_v59 = vld [vmem:[%s2272_s8 + $0x2f4] ss:$8 sps:$4 sm:$0xff]  }
  0x8d   : > { %1123 = vmatpush2.bf16.msra.mxu0 %v1780_v62  ;;  %v1852_v62 = vld [vmem:[%s2272_s8 + $0x3f0] ss:$8 sps:$4 sm:$0xff]  }
  0x8e   : > { %1164 = vmatpush2.bf16.msra.mxu1 %v1781_v1  ;;  %1124 = vmatprep.subr.bf16.mxu0 %v1782_v2  ;;  %v1855_v1 = vld [vmem:[%s2272_s8 + $0x2e0] ss:$8 sps:$4 sm:$0xff]  }
  0x8f   : > { %1165 = vmatprep.subr.bf16.mxu1 %v1784_v3  ;;  %v1858_v2 = vld [vmem:[%s2272_s8 + $0x3e0] ss:$8 sps:$4 sm:$0xff]   ;;  %v1863_v3 = vld [vmem:[%s2272_s8 + $0x2d4] ss:$8 sps:$4 sm:$0xff]  }
  0x91   : > { %1125 = vmatpush2.bf16.msra.mxu0 %v1786_v5  ;;  %v1861_v5 = vld [vmem:[%s2272_s8 + $0x2d0] ss:$8 sps:$4 sm:$0xff]  }
  0x92   : > { %1166 = vmatpush2.bf16.msra.mxu1 %v1787_v6  ;;  %1126 = vmatprep.subr.bf16.mxu0 %v1788_v7  ;;  %v1864_v6 = vld [vmem:[%s2272_s8 + $0x3d0] ss:$8 sps:$4 sm:$0xff]   ;;  %v1869_v7 = vld [vmem:[%s2272_s8 + $0x2c4] ss:$8 sps:$4 sm:$0xff]  }
  0x93   : > { %1167 = vmatprep.subr.bf16.mxu1 %v1790_v8  ;;  %v1872_v8 = vld [vmem:[%s2272_s8 + $0x3c4] ss:$8 sps:$4 sm:$0xff]  }
  0x95   : > { %1127 = vmatpush2.bf16.msra.mxu0 %v1792_v9  ;;  %v1867_v9 = vld [vmem:[%s2272_s8 + $0x2c0] ss:$8 sps:$4 sm:$0xff]  }
  0x96   : > { %1168 = vmatpush2.bf16.msra.mxu1 %v1793_v10  ;;  %1128 = vmatprep.subr.bf16.mxu0 %v1794_v11  ;;  %v1870_v10 = vld [vmem:[%s2272_s8 + $0x3c0] ss:$8 sps:$4 sm:$0xff]   ;;  %v1875_v11 = vld [vmem:[%s2272_s8 + $0x2b4] ss:$8 sps:$4 sm:$0xff]  }
  0x97   : > { %1169 = vmatprep.subr.bf16.mxu1 %v1796_v12  ;;  %v1878_v12 = vld [vmem:[%s2272_s8 + $0x3b4] ss:$8 sps:$4 sm:$0xff]  }
  0x99   : > { %1129 = vmatpush2.bf16.msra.mxu0 %v1798_v13  ;;  %v1873_v13 = vld [vmem:[%s2272_s8 + $0x2b0] ss:$8 sps:$4 sm:$0xff]  }
  0x9a   : > { %1170 = vmatpush2.bf16.msra.mxu1 %v1799_v14  ;;  %1180 = vmatprep.subr.bf16.mxu0 %v1803_v15  ;;  %v1876_v14 = vld [vmem:[%s2272_s8 + $0x3b0] ss:$8 sps:$4 sm:$0xff]   ;;  %v1881_v15 = vld [vmem:[%s2272_s8 + $0x2a4] ss:$8 sps:$4 sm:$0xff]  }
  0x9b   : > { %1221 = vmatprep.subr.bf16.mxu1 %v1806_v16  ;;  %v1884_v16 = vld [vmem:[%s2272_s8 + $0x3a4] ss:$8 sps:$4 sm:$0xff]  }
  0x9c   : > { %1131 = vmatmul.mubr.bf16.vlgmr.msra.gmra.mxu0 %v322_v17  ;;  %v1879_v17 = vld [vmem:[%s2272_s8 + $0x2a0] ss:$8 sps:$4 sm:$0xff]  }
  0x9d   : > { %1172 = vmatmul.mubr.bf16.vlgmr.msra.gmra.mxu1 %v324_v18  ;;  %1181 = vmatpush1.bf16.msra.mxu0 %v1801_v19  ;;  %v1882_v18 = vld [vmem:[%s2272_s8 + $0x3a0] ss:$8 sps:$4 sm:$0xff]   ;;  %v1887_v19 = vld [vmem:[%s2272_s8 + $0x294] ss:$8 sps:$4 sm:$0xff]  }
  0x9e   : > { %1222 = vmatpush1.bf16.msra.mxu1 %v1804_v20  ;;  %1182 = vmatprep.subr.bf16.mxu0 %v1809_v21  ;;  %v1890_v20 = vld [vmem:[%s2272_s8 + $0x394] ss:$8 sps:$4 sm:$0xff]   ;;  %v1885_v21 = vld [vmem:[%s2272_s8 + $0x290] ss:$8 sps:$4 sm:$0xff]  }
  0x9f   : > { %1223 = vmatprep.subr.bf16.mxu1 %v1812_v22  ;;  %1212 = vmatprep.mubr.bf16.mxu0 %v327_v54  ;;  %v1888_v22 = vld [vmem:[%s2272_s8 + $0x390] ss:$8 sps:$4 sm:$0xff]   ;;  %v275_v54 = vld [vmem:[#allocation2] sm:$0xf] }
  0xa0   : > { %1253 = vmatprep.mubr.bf16.mxu1 %v329_v58 }
  0xa1   : > { %1183 = vmatpush1.bf16.msra.mxu0 %v1807_v23  ;;  %v1893_v23 = vld [vmem:[%s2272_s8 + $0x284] ss:$8 sps:$4 sm:$0xff]  }
  0xa2   : > { %1224 = vmatpush1.bf16.msra.mxu1 %v1810_v24  ;;  %1184 = vmatprep.subr.bf16.mxu0 %v1815_v25  ;;  %v1896_v24 = vld [vmem:[%s2272_s8 + $0x384] ss:$8 sps:$4 sm:$0xff]   ;;  %v1891_v25 = vld [vmem:[%s2272_s8 + $0x280] ss:$8 sps:$4 sm:$0xff]  }
  0xa3   : > { %1225 = vmatprep.subr.bf16.mxu1 %v1818_v26  ;;  %v1894_v26 = vld [vmem:[%s2272_s8 + $0x380] ss:$8 sps:$4 sm:$0xff]  }
  0xa5   : > { %1185 = vmatpush1.bf16.msra.mxu0 %v1813_v27  ;;  %v326_v27 = vpack.c.bf16 %v2399_v45, %v2399_v45 }
  0xa6   : > { %1226 = vmatpush1.bf16.msra.mxu1 %v1816_v28  ;;  %1186 = vmatprep.subr.bf16.mxu0 %v1821_v29  ;;  %v328_v28 = vpack.c.bf16 %v2406_v51, %v2406_v51 }
  0xa7   : > { %1227 = vmatprep.subr.bf16.mxu1 %v1824_v30 }
  0xa9   : > { %1187 = vmatpush1.bf16.msra.mxu0 %v1819_v31 }
  0xaa   : > { %1228 = vmatpush1.bf16.msra.mxu1 %v1822_v32  ;;  %1188 = vmatprep.subr.bf16.mxu0 %v1827_v33 }
  0xab   : > { %1229 = vmatprep.subr.bf16.mxu1 %v1830_v34 }
  0xad   : > { %1189 = vmatpush1.bf16.msra.mxu0 %v1825_v35 }
  0xae   : > { %1230 = vmatpush1.bf16.msra.mxu1 %v1828_v36  ;;  %1190 = vmatprep.subr.bf16.mxu0 %v1833_v37 }
  0xaf   : > { %1231 = vmatprep.subr.bf16.mxu1 %v1836_v38 }
  0xb1   : > { %1191 = vmatpush1.bf16.msra.mxu0 %v1831_v39 }
  0xb2   : > { %1232 = vmatpush1.bf16.msra.mxu1 %v1834_v40  ;;  %1192 = vmatprep.subr.bf16.mxu0 %v1839_v41 }
  0xb3   : > { %1233 = vmatprep.subr.bf16.mxu1 %v1842_v42 }
  0xb5   : > { %1193 = vmatpush1.bf16.msra.mxu0 %v1837_v47 }
  0xb6   : > { %1234 = vmatpush1.bf16.msra.mxu1 %v1840_v48  ;;  %1194 = vmatprep.subr.bf16.mxu0 %v1845_v52 }
  0xb7   : > { %1235 = vmatprep.subr.bf16.mxu1 %v1848_v53 }
  0xb9   : > { %1195 = vmatpush1.bf16.msra.mxu0 %v1843_v56 }
  0xba   : > { %1236 = vmatpush1.bf16.msra.mxu1 %v1846_v57  ;;  %1196 = vmatprep.subr.bf16.mxu0 %v1851_v59 }
  0xbb   : > { %1237 = vmatprep.subr.bf16.mxu1 %v1854_v60 }
  0xbd   : > { %1197 = vmatpush2.bf16.msra.mxu0 %v1849_v61 }
  0xbe   : > { %1238 = vmatpush2.bf16.msra.mxu1 %v1852_v62  ;;  %1198 = vmatprep.subr.bf16.mxu0 %v1857_v63 }
  0xbf   : > { %1239 = vmatprep.subr.bf16.mxu1 %v1860_v0 }
  0xc1   : > { %1199 = vmatpush2.bf16.msra.mxu0 %v1855_v1 }
  0xc2   : > { %1240 = vmatpush2.bf16.msra.mxu1 %v1858_v2  ;;  %1200 = vmatprep.subr.bf16.mxu0 %v1863_v3 }
  0xc3   : > { %1241 = vmatprep.subr.bf16.mxu1 %v1866_v4 }
  0xc5   : > { %1201 = vmatpush2.bf16.msra.mxu0 %v1861_v5 }
  0xc6   : > { %1242 = vmatpush2.bf16.msra.mxu1 %v1864_v6  ;;  %1202 = vmatprep.subr.bf16.mxu0 %v1869_v7 }
  0xc7   : > { %1243 = vmatprep.subr.bf16.mxu1 %v1872_v8 }
  0xc9   : > { %1203 = vmatpush2.bf16.msra.mxu0 %v1867_v9 }
  0xca   : > { %1244 = vmatpush2.bf16.msra.mxu1 %v1870_v10  ;;  %1204 = vmatprep.subr.bf16.mxu0 %v1875_v11 }
  0xcb   : > { %1245 = vmatprep.subr.bf16.mxu1 %v1878_v12 }
  0xcd   : > { %1205 = vmatpush2.bf16.msra.mxu0 %v1873_v13 }
  0xce   : > { %1246 = vmatpush2.bf16.msra.mxu1 %v1876_v14  ;;  %1206 = vmatprep.subr.bf16.mxu0 %v1881_v15 }
  0xcf   : > { %1247 = vmatprep.subr.bf16.mxu1 %v1884_v16 }
  0xd1   : > { %1207 = vmatpush2.bf16.msra.mxu0 %v1879_v17 }
  0xd2   : > { %1248 = vmatpush2.bf16.msra.mxu1 %v1882_v18  ;;  %1208 = vmatprep.subr.bf16.mxu0 %v1887_v19 }
  0xd3   : > { %1249 = vmatprep.subr.bf16.mxu1 %v1890_v20 }
  0xd5   : > { %1209 = vmatpush2.bf16.msra.mxu0 %v1885_v21 }
  0xd6   : > { %1250 = vmatpush2.bf16.msra.mxu1 %v1888_v22  ;;  %1210 = vmatprep.subr.bf16.mxu0 %v1893_v23 }
  0xd7   : > { %1251 = vmatprep.subr.bf16.mxu1 %v1896_v24 }
  0xd9   : > { %1211 = vmatpush2.bf16.msra.mxu0 %v1891_v25 }
  0xda   : > { %1252 = vmatpush2.bf16.msra.mxu1 %v1894_v26 }
  0xdc   : > { %1213 = vmatmul.mubr.bf16.vlgmr.msra.gmra.mxu0 %v326_v27 }
  0xdd   : > { %1254 = vmatmul.mubr.bf16.vlgmr.msra.gmra.mxu1 %v328_v28 }
 0x15c   : > { %v1132_v29 = vpop.f32.mrf.mxu0 }
 0x15d   : > { %v1173_v30 = vpop.f32.mrf.mxu1 }
 0x15e   : > { %v1174_v31 = vadd.f32 %v1173_v30, %v1132_v29  ;;  %v1134_v32 = vpop.f32.mrf.mxu0 }
 0x15f   : > { %v1175_v33 = vpop.f32.mrf.mxu1 }
 0x160   : > { %v1136_v34 = vpop.f32.mrf.mxu0  ;;  %v1176_v40 = vadd.f32 %v1175_v33, %v1134_v32 }
 0x161   : > { %v1177_v35 = vpop.f32.mrf.mxu1 }
 0x162   : > { %v1137_v36 = vpop.f32.mrf.mxu0 }
 0x163   : > { %v1178_v37 = vpop.f32.mrf.mxu1 }
 0x19c   : > { %v1214_v38 = vpop.f32.mrf.mxu0 }
 0x19d   : > { %v1255_v39 = vpop.f32.mrf.mxu1  ;;  %v1215_v41 = vadd.f32 %v1214_v38, %v1174_v31 }
 0x19e   : > { %v1216_v42 = vpop.f32.mrf.mxu0 }
 0x19f   : > { %v1257_v43 = vpop.f32.mrf.mxu1  ;;  %v1217_v45 = vadd.f32 %v1216_v42, %v1176_v40  ;;  %v1256_v48 = vadd.f32 %v1255_v39, %v1215_v41 }
 0x1a0   : > { %v1218_v46 = vpop.f32.mrf.mxu0 }
 0x1a1   : > { %v1259_v47 = vpop.f32.mrf.mxu1  ;;  %v1258_v49 = vadd.f32 %v1257_v43, %v1217_v45 }
 0x1a2   : > { %v1219_v51 = vpop.f32.mrf.mxu0 }
 0x1a3   : > { %v1260_v52 = vpop.f32.mrf.mxu1  ;;  %v1264_v53 = vcombine.low %v1256_v48, %v1258_v49 }
 0x1a5   : > { %v1271_v55 = vrot.slane %v1264_v53, %v2346_v50  ;;  %1278 = sbr.rel (%p1583_p10) target bundleno = 439 (0x1b7), region = 48 }
 0x1a7   : > { %v1273_v56 = vadd.f32 %v1271_v55, %v275_v54 }
 0x1a9   : > { %1274 = vst [vmem:[#allocation2] sm:$0xf] %v1273_v56 }
 0x1aa   : > { %v1280_v57 = vld [vmem:[%s2283_s11] sm:$0x3]  ;;  %v1284_v58 = vsub.s32 0, %v2338_v44  ;;  %v1288_v59 = vsub.s32 1, %v2338_v44 }
 0x1ac   : > { %v1285_v60 = vrot.slane %v1280_v57, %v1284_v58  ;;  %v1289_v61 = vrot.slane %v1280_v57, %v1288_v59 }
 0x1ae   : > { %v1290_v62 = vcombine.low %v1285_v60, %v1289_v61 }
 0x1b0   : > { %v1279_v63 = vld [vmem:[#allocation2] sm:$0xf]  ;;  %v1297_v0 = vrot.slane %v1290_v62, %v2346_v50 }
 0x1b2   : > { %v1299_v1 = vadd.f32 %v1297_v0, %v1279_v63 }
 0x1b4   : > { %v1300_v2 = vmax.f32 %v1299_v1, 0.0 }
 0x1b6   : > { %1301 = vst [vmem:[%s2296_s1] sm:$0xf] %v1300_v2 }
 0x1b7 PF: > { %s1591_s18 = sshll.u32 %s2066_s19, 6  ;;  %s1317_s8 = sshll.u32 %s2296_s1, 4  ;;  %s1318_s8 = int_to_ptr.vmem [resolvable:$true] %s1317_s8 }
 0x1b8   : > { %s1315_s25 = scalar_lea.hbm %s2515_s3, %s1591_s18  ;;  %s1303_s23 = scalar_lea.sflag [#allocation5], %s2279_s21 }
 0x1b9   : > { %s1954_s5 = scalar_lea.vmem %s1318_s8, 64  ;;  %p2534_p3 = scmp.ne.s32.totalorder %s2530_s27, 0 }
 0x1ba   : > { %p1955_p11 = scmp.ne.s32.totalorder %s1318_s8, %s1954_s5  ;;  %s2087_s11 = smov [#allocation8]  }
 0x1bb   : > { %s1958_s4 = sshll.u32 %s2087_s11, 4  ;;  %s1959_s4 = int_to_ptr.vmem [resolvable:$false] %s1958_s4 }
 0x1bc   : > { %p1956_p5 = pnand %p1955_p11, %p2534_p3  ;;  %s1960_s10 = scalar_lea.vmem %s1959_s4, 128 }
 0x1bd   : > { %p1961_p12 = scmp.lt.s32.totalorder %s1318_s8, %s1959_s4  ;;  %p1962_p2 = scmp.lt.s32.totalorder %s1960_s10, %s1954_s5 }
 0x1be   : > { %p1957_p9 = pneg %p1956_p5 }
 0x1bf   : > { %p1963_p6 = por %p1962_p2, %p1961_p12 }
 0x1c1   : > { %p1964_p0 = pnand %p1963_p6, %p1957_p9 }
 0x1c3   : > { %1967 = shalt.err (!%p1964_p0)
}
 0x1c4   : > { %s1968_s19 = scalar_lea.hbm %s1315_s25, 64  ;;  %s1972_s29 = scalar_lea.hbm %s2515_s3, 128 }
 0x1c5   : > { %p1969_p13 = scmp.ne.s32.totalorder %s1315_s25, %s1968_s19  ;;  %p1973_p4 = scmp.lt.s32.totalorder %s1315_s25, %s2515_s3 }
 0x1c6   : > { %p1974_p7 = scmp.lt.s32.totalorder %s1972_s29, %s1968_s19 }
 0x1c7   : > { %p1970_p1 = pnand %p1969_p13, %p2534_p3 }
 0x1c8   : > { %p1975_p10 = por %p1974_p7, %p1973_p4 }
 0x1c9   : > { %p1971_p8 = pneg %p1970_p1 }
 0x1cb   : > { %p1976_p11 = pnand %p1975_p10, %p1971_p8 }
 0x1cd   : > { %1979 = shalt.err (!%p1976_p11)
}
 0x1ce   : > { %1596 = dma.vmem_to_hbm [thread:$0]  (%p2534_p3), %s1318_s8, 64, %s1315_s25, %s1303_s23  }
 0x1cf PF: > { %p1610_p5 = scmp.ge.s32.totalorder %s2078_s22, 2  ;;  %s1329_s1 = sand.u32 1, %s2038_s12  }
 0x1d0   : > { %p2535_p9 = scmp.ne.s32.totalorder %s2532_s6, 0  ;;  %s1330_s18 = scalar_lea.sflag [#allocation5], %s1329_s1 }
 0x1d2   : > { %p1606_p12 = pnand %p1610_p5, %p2535_p9 }
 0x1d4   : > { %p1607_p2 = pneg %p1606_p12 }
 0x1d6   : > { %2033 = dma.done.wait (%p1607_p2), %s1330_s18, 64  }
 0x1d7   : > { %2035 = vsyncadd (%p1607_p2), %s1330_s18, 4294967232  ;;  %s22_s22 = sadd.s32 1, %s2078_s22   ;;  %s2536_s19 = sld [smem:[#allocation12_spill]] }
 0x1d8   : > { %p19_p6 = scmp.ge.s32.totalorder %s22_s22, 10   ;;  %s2537_s27 = sld [smem:[#allocation13_spill]] }
 0x1d9   : > { %s2538_s21 = sld [smem:[#allocation14_spill]]  ;;  %s2539_s12 = smov %s2042_s13 }
 0x1da   : > { %s2540_s13 = smov %s2046_s14  ;;  %s2541_s14 = smov %s2238_s28 }
 0x1db   : > { %s2542_s15 = smov %s2054_s16  ;;  %s2543_s16 = smov %s2058_s17 }
 0x1dc   : > { %s2544_s17 = smov %s2243_s30  ;;  %s2545_s18 = smov %s2070_s20 }
 0x1dd   :  { %21 = sbr.rel (!%p19_p6) target bundleno = 13 (0xd), region = 101 }
 0x1de   : > { %s2546_s20 = smov %s2537_s27 }
 0x1e2   :  { %1335 = vsyncpa [#allocation4], 1 }
 0x1e3   :  { %1337 = vsyncpa [#allocation4 + $0x1], 1 }
 0x1e4   :  { %1338 = vsyncpa [#allocation7], 1 }
 0x1e5   :  { %1340 = vsyncpa [#allocation7 + $0x1], 1 }
 0x1e6   :  { %1341 = vsyncpa [#allocation5], 1 }
 0x1e7   :  { %1343 = vsyncpa [#allocation5 + $0x1], 1 }

// kernel: forward.2
= control target key start
LH: loop header
LB: loop body
LE: loop exit
PB: predicated region body
PF: predicated region fallthrough
CT: control target
= control target key end

     0   :  { %8 = vsyncpa [#allocation4], 0  ;;  %s3826_s0 = inlined_call_operand.vmem [shape: f32[2,8,8,64], index: 0, kind: input, shape index: {}]   ;;  %s3827_s1 = inlined_call_operand.hbm [shape: f32[8,7,64,64], index: 1, kind: input, shape index: {}]   ;;  %s3828_s2 = inlined_call_operand.hbm [shape: f32[8,1,64], index: 2, kind: input, shape index: {}]   ;;  %s3829_s3 = inlined_call_operand.vmem [shape: f32[2,8,8,64], index: 3, kind: output, shape index: {}]  }
   0x1   :  { %10 = vsyncpa [#allocation4 + $0x1], 0 }
   0x2   :  { %11 = vsyncpa [#allocation6], 0 }
   0x3   :  { %13 = vsyncpa [#allocation6 + $0x1], 0  ;;  %s2937_s12 = smov 0   ;;  %s2939_s13 = smov 0  }
   0x4   :  { %s2941_s14 = smov 0   ;;  %s2943_s15 = smov 0  }
   0x5 LB: > { %s2956_s16 = sadd.s32 4294967295, %s2910_s15   ;;  %s2959_s17 = sadd.s32 1, %s2910_s15   ;;  %s2910_s15 = sphi %s2943_s15, %s3880_s15   ;;  %s2906_s14 = sphi %s2941_s14, %s3879_s14   ;;  %s2902_s13 = sphi %s2939_s13, %s3878_s13   ;;  %s2898_s12 = sphi %s2937_s12, %s3877_s12  }
   0x6   : > { %s44_s18 = ssub.s32 %s2910_s15, %s2959_s17  ;;  %s47_s19 = sadd.s32 1, %s2906_s14 }
   0x7   : > { %p45_p0 = scmp.eq.s32.totalorder %s44_s18, 0  ;;  %p54_p1 = scmp.ne.s32.totalorder %s2906_s14, %s2902_s13 }
   0x8   : > { %p55_p2 = scmp.eq.s32.totalorder %s2910_s15, 0  ;;  %p60_p3 = scmp.ne.s32.totalorder %s2902_s13, %s2898_s12 }
   0x9   : > { %s2969_s20 = scalar_select %p45_p0, %s2906_s14, %s47_s19  }
   0xa   : > { %p56_p4 = por %p55_p2, %p54_p1  ;;  %p61_p5 = scmp.eq.s32.totalorder %s2956_s16, 0 }
   0xb   : > { %p2780_p6 = scmp.lt.s32.totalorder %s2910_s15, 8  ;;  %s2978_s22 = sand.u32 1, %s2906_s14  }
   0xc   : > { %p2973_p7 = por %p61_p5, %p60_p3  ;;  %s2766_s23 = smul.u32 448, %s2978_s22 }
   0xd   : > { %s2767_s24 = smul.u32 7168, %s2910_s15  ;;  %p2982_p8 = pnand %p2780_p6, %p56_p4 }
   0xe   : > { %s3831_s21 = scalar_select %p2973_p7, 1, 0 }
   0xf   : > { %s2989_s28 = scalar_lea.hbm %s3827_s1, %s2767_s24  ;;  %s138_s29 = scalar_lea.vmem [#allocation3], %s2766_s23 }
  0x10   : > { %s145_s30 = sshll.u32 %s138_s29, 4  ;;  %s135_s4 = scalar_lea.sflag [#allocation4], %s2978_s22  ;;  %s2991_s30 = int_to_ptr.vmem [resolvable:$true] %s145_s30 }
  0x11   : > { %s2816_s5 = scalar_lea.hbm %s2989_s28, 7168  ;;  %p2818_p11 = pneg %p2982_p8 }
  0x12   : > { %p2817_p10 = scmp.ne.s32.totalorder %s2989_s28, %s2816_s5  ;;  %s2821_s8 = scalar_lea.hbm %s3827_s1, 57344 }
  0x13   : > { %p2822_p0 = scmp.lt.s32.totalorder %s2989_s28, %s3827_s1  ;;  %p2823_p1 = scmp.lt.s32.totalorder %s2821_s8, %s2816_s5 }
  0x14   : > { %p2819_p12 = pnand %p2818_p11, %p2817_p10 }
  0x15   : > { %p2824_p2 = por %p2823_p1, %p2822_p0 }
  0x16   : > { %p2820_p13 = pneg %p2819_p12 }
  0x18   : > { %p2825_p3 = pnand %p2824_p2, %p2820_p13 }
  0x1a   : > { %2828 = shalt.err (!%p2825_p3)
}
  0x1b   : > { %s2829_s11 = scalar_lea.vmem %s2991_s30, 7168  ;;  %s2912_s12 = smov [#allocation3]  }
  0x1c   : > { %p2830_p4 = scmp.ne.s32.totalorder %s2991_s30, %s2829_s11  ;;  %s2834_s18 = sshll.u32 %s2912_s12, 4  ;;  %s2835_s18 = int_to_ptr.vmem [resolvable:$false] %s2834_s18 }
  0x1d   : > { %s2836_s19 = scalar_lea.vmem %s2835_s18, 14336  ;;  %p2837_p10 = scmp.lt.s32.totalorder %s2991_s30, %s2835_s18 }
  0x1e   : > { %p2832_p5 = pnand %p2830_p4, %p2818_p11  ;;  %p2838_p12 = scmp.lt.s32.totalorder %s2836_s19, %s2829_s11 }
  0x20   : > { %p2833_p6 = pneg %p2832_p5  ;;  %p2839_p9 = por %p2838_p12, %p2837_p10 }
  0x22   : > { %p2840_p0 = pnand %p2839_p9, %p2833_p6 }
  0x24   : > { %2843 = shalt.err (!%p2840_p0)
}
  0x25   : > { %s2913_s23 = smov 128   ;;  %s2914_s24 = smov 8  }
  0x26   : > { %2776 = dma.hbm_to_vmem [thread:$0]  (!%p2982_p8), %s2989_s28, 7168, %s2991_s30, %s135_s4, %s2913_s23, %s2913_s23, %s2914_s24  }
  0x27   : > { %p170_p13 = scmp.lt.s32.totalorder %s2910_s15, 9  ;;  %s2135_s26 = sshll.u32 %s2910_s15, 4 }
  0x28   : > { %p3833_p1 = scmp.ge.s32.totalorder %s2910_s15, 1  ;;  %s3032_s6 = scalar_lea.hbm %s3828_s2, %s2135_s26 }
  0x29   : > { %s158_s7 = scalar_lea.vmem [#allocation5], %s2978_s22  ;;  %s156_s9 = scalar_lea.sflag [#allocation6], %s2978_s22 }
  0x2a   : > { %p3025_p9 = pnand %p3833_p1, %p170_p13  ;;  %s165_s8 = sshll.u32 %s158_s7, 4  ;;  %s166_s8 = int_to_ptr.vmem [resolvable:$true] %s165_s8 }
  0x2b   : > { %s2844_s28 = scalar_lea.hbm %s3032_s6, 16  ;;  %s2849_s4 = scalar_lea.hbm %s3828_s2, 128 }
  0x2c   : > { %s3834_s27 = scalar_select %p3025_p9, 1, 0 }
  0x2d   : > { %p2845_p2 = scmp.ne.s32.totalorder %s3032_s6, %s2844_s28  ;;  %p2850_p5 = scmp.lt.s32.totalorder %s3032_s6, %s3828_s2 }
  0x2e   : > { %p2851_p6 = scmp.lt.s32.totalorder %s2849_s4, %s2844_s28 }
  0x2f   : > { %p2847_p3 = pnand %p2845_p2, %p2818_p11 }
  0x30   : > { %p2852_p10 = por %p2851_p6, %p2850_p5 }
  0x31   : > { %p2848_p4 = pneg %p2847_p3 }
  0x33   : > { %p2853_p12 = pnand %p2852_p10, %p2848_p4 }
  0x35   : > { %2856 = shalt.err (!%p2853_p12)
}
  0x36   : > { %s2857_s12 = scalar_lea.vmem %s166_s8, 16  ;;  %s2915_s22 = smov [#allocation5]  }
  0x37   : > { %p2858_p0 = scmp.ne.s32.totalorder %s166_s8, %s2857_s12  ;;  %s2862_s18 = sshll.u32 %s2915_s22, 4  ;;  %s2863_s18 = int_to_ptr.vmem [resolvable:$false] %s2862_s18 }
  0x38   : > { %s2864_s19 = scalar_lea.vmem %s2863_s18, 32  ;;  %p2865_p2 = scmp.lt.s32.totalorder %s166_s8, %s2863_s18 }
  0x39   : > { %p2860_p13 = pnand %p2858_p0, %p2818_p11  ;;  %p2866_p3 = scmp.lt.s32.totalorder %s2864_s19, %s2857_s12 }
  0x3b   : > { %p2861_p1 = pneg %p2860_p13  ;;  %p2867_p7 = por %p2866_p3, %p2865_p2 }
  0x3d   : > { %p2868_p9 = pnand %p2867_p7, %p2861_p1 }
  0x3f   : > { %2871 = shalt.err (!%p2868_p9)
}
  0x40   : > { %2779 = dma.hbm_to_vmem [thread:$0]  (!%p2982_p8), %s3032_s6, 16, %s166_s8, %s156_s9  }
  0x41   : > { %p3835_p4 = scmp.ne.s32.totalorder %s3834_s27, 0 }
  0x43   : > { %174 = sbr.rel (%p3835_p4) target bundleno = 460 (0x1cc), region = 32 }
  0x48   : > { %s3057_s23 = sand.u32 1, %s2902_s13   ;;  %p3836_p11 = scmp.ne.s32.totalorder %s3831_s21, 0 }
  0x49   : > { %s2768_s24 = smul.u32 448, %s3057_s23  ;;  %s177_s26 = scalar_lea.sflag [#allocation4], %s3057_s23 }
  0x4b   : > { %s3061_s29 = scalar_lea.vmem [#allocation3], %s2768_s24 }
  0x4c   : > { %2889 = dma.done.wait (%p3836_p11), %s177_s26, 7168  }
  0x4d   : > { %2891 = vsyncadd (%p3836_p11), %s177_s26, 4294960128  ;;  %s186_s25 = scalar_lea.sflag [#allocation6], %s3057_s23  ;;  %s188_s27 = scalar_lea.vmem [#allocation5], %s3057_s23 }
  0x4e   : > { %2893 = dma.done.wait (%p3836_p11), %s186_s25, 16  }
  0x4f   : > { %2895 = vsyncadd (%p3836_p11), %s186_s25, 4294967280  ;;  %p2137_p7 = scmp.ne.s32.totalorder %s2956_s16, 0 }
  0x51   : > { %213 = sbr.rel (%p2137_p7) target bundleno = 115 (0x73), region = 44 }
  0x56   : > { %vm214_vm0 = vcmask 523264   ;;  %vm216_vm1 = vcmask 517120   ;;  %v256_v0 = vld [vmem:[%s3826_s0] sm:$0xff]  ;;  %v257_v1 = vld [vmem:[%s3826_s0 + $0x8] sm:$0xff]  ;;  %v258_v2 = vld [vmem:[%s3826_s0 + $0x10] sm:$0xff]  ;;  %v2916_v3 = vmov 0.0  }
  0x57   : > { %218 = vst.msk [vmem:[#allocation2 + $0x10] sm:$0xff] %vm214_vm0, %v2916_v3  ;;  %215 = vst.msk [vmem:[#allocation2] sm:$0xff] %vm214_vm0, %v2916_v3  ;;  %v259_v4 = vld [vmem:[%s3826_s0 + $0x18] sm:$0xff]  ;;  %v260_v5 = vld [vmem:[%s3826_s0 + $0x20] sm:$0xff] }
  0x58   : > { %220 = vst.msk [vmem:[#allocation2 + $0x20] sm:$0xff] %vm214_vm0, %v2916_v3  ;;  %222 = vst.msk [vmem:[#allocation2 + $0x30] sm:$0xff] %vm214_vm0, %v2916_v3  ;;  %v261_v6 = vld [vmem:[%s3826_s0 + $0x28] sm:$0xff]  ;;  %v262_v7 = vld [vmem:[%s3826_s0 + $0x30] sm:$0xff] }
  0x59   : > { %224 = vst.msk [vmem:[#allocation2 + $0x40] sm:$0xff] %vm214_vm0, %v2916_v3  ;;  %226 = vst.msk [vmem:[#allocation2 + $0x50] sm:$0xff] %vm214_vm0, %v2916_v3  ;;  %v263_v8 = vld [vmem:[%s3826_s0 + $0x38] sm:$0xff]  ;;  %v264_v9 = vld [vmem:[%s3826_s0 + $0x40] sm:$0xff] }
  0x5a   : > { %228 = vst.msk [vmem:[#allocation2 + $0x60] sm:$0xff] %vm214_vm0, %v2916_v3  ;;  %230 = vst.msk [vmem:[#allocation2 + $0x70] sm:$0xff] %vm214_vm0, %v2916_v3  ;;  %v265_v10 = vld [vmem:[%s3826_s0 + $0x48] sm:$0xff]  ;;  %v266_v11 = vld [vmem:[%s3826_s0 + $0x50] sm:$0xff] }
  0x5b   : > { %232 = vst.msk [vmem:[#allocation2 + $0x80] sm:$0xff] %vm214_vm0, %v2916_v3  ;;  %234 = vst.msk [vmem:[#allocation2 + $0x90] sm:$0xff] %vm214_vm0, %v2916_v3  ;;  %v267_v12 = vld [vmem:[%s3826_s0 + $0x58] sm:$0xff]  ;;  %v268_v13 = vld [vmem:[%s3826_s0 + $0x60] sm:$0xff] }
  0x5c   : > { %236 = vst.msk [vmem:[#allocation2 + $0xa0] sm:$0xff] %vm214_vm0, %v2916_v3  ;;  %238 = vst.msk [vmem:[#allocation2 + $0xb0] sm:$0xff] %vm214_vm0, %v2916_v3  ;;  %v269_v14 = vld [vmem:[%s3826_s0 + $0x68] sm:$0xff]  ;;  %v270_v15 = vld [vmem:[%s3826_s0 + $0x70] sm:$0xff] }
  0x5d   : > { %240 = vst.msk [vmem:[#allocation2 + $0xc0] sm:$0xff] %vm214_vm0, %v2916_v3  ;;  %242 = vst.msk [vmem:[#allocation2 + $0xd0] sm:$0xff] %vm214_vm0, %v2916_v3  ;;  %v271_v16 = vld [vmem:[%s3826_s0 + $0x78] sm:$0xff] }
  0x5e   : > { %244 = vst.msk [vmem:[#allocation2 + $0xe0] sm:$0xff] %vm214_vm0, %v2916_v3  ;;  %246 = vst.msk [vmem:[#allocation2 + $0xf0] sm:$0xff] %vm214_vm0, %v2916_v3 }
  0x5f   : > { %248 = vst.msk [vmem:[#allocation2 + $0x100] sm:$0xff] %vm214_vm0, %v2916_v3  ;;  %250 = vst.msk [vmem:[#allocation2 + $0x110] sm:$0xff] %vm214_vm0, %v2916_v3 }
  0x60   : > { %252 = vst.msk [vmem:[#allocation2 + $0x120] sm:$0xff] %vm214_vm0, %v2916_v3  ;;  %254 = vst.msk [vmem:[#allocation2 + $0x130] sm:$0xff] %vm214_vm0, %v2916_v3 }
  0x61   : > { %219 = vst.msk [vmem:[#allocation2 + $0x18] sm:$0x3] %vm216_vm1, %v2916_v3  ;;  %217 = vst.msk [vmem:[#allocation2 + $0x8] sm:$0x3] %vm216_vm1, %v2916_v3 }
  0x62   : > { %221 = vst.msk [vmem:[#allocation2 + $0x28] sm:$0x3] %vm216_vm1, %v2916_v3  ;;  %223 = vst.msk [vmem:[#allocation2 + $0x38] sm:$0x3] %vm216_vm1, %v2916_v3 }
  0x63   : > { %225 = vst.msk [vmem:[#allocation2 + $0x48] sm:$0x3] %vm216_vm1, %v2916_v3  ;;  %227 = vst.msk [vmem:[#allocation2 + $0x58] sm:$0x3] %vm216_vm1, %v2916_v3 }
  0x64   : > { %229 = vst.msk [vmem:[#allocation2 + $0x68] sm:$0x3] %vm216_vm1, %v2916_v3  ;;  %231 = vst.msk [vmem:[#allocation2 + $0x78] sm:$0x3] %vm216_vm1, %v2916_v3 }
  0x65   : > { %233 = vst.msk [vmem:[#allocation2 + $0x88] sm:$0x3] %vm216_vm1, %v2916_v3  ;;  %235 = vst.msk [vmem:[#allocation2 + $0x98] sm:$0x3] %vm216_vm1, %v2916_v3 }
  0x66   : > { %237 = vst.msk [vmem:[#allocation2 + $0xa8] sm:$0x3] %vm216_vm1, %v2916_v3  ;;  %239 = vst.msk [vmem:[#allocation2 + $0xb8] sm:$0x3] %vm216_vm1, %v2916_v3 }
  0x67   : > { %241 = vst.msk [vmem:[#allocation2 + $0xc8] sm:$0x3] %vm216_vm1, %v2916_v3  ;;  %243 = vst.msk [vmem:[#allocation2 + $0xd8] sm:$0x3] %vm216_vm1, %v2916_v3 }
  0x68   : > { %245 = vst.msk [vmem:[#allocation2 + $0xe8] sm:$0x3] %vm216_vm1, %v2916_v3  ;;  %247 = vst.msk [vmem:[#allocation2 + $0xf8] sm:$0x3] %vm216_vm1, %v2916_v3 }
  0x69   : > { %249 = vst.msk [vmem:[#allocation2 + $0x108] sm:$0x3] %vm216_vm1, %v2916_v3  ;;  %251 = vst.msk [vmem:[#allocation2 + $0x118] sm:$0x3] %vm216_vm1, %v2916_v3 }
  0x6a   : > { %253 = vst.msk [vmem:[#allocation2 + $0x128] sm:$0x3] %vm216_vm1, %v2916_v3  ;;  %255 = vst.msk [vmem:[#allocation2 + $0x138] sm:$0x3] %vm216_vm1, %v2916_v3 }
  0x6b   : > { %273 = vst.msk [vmem:[#allocation2 + $0x11] sm:$0xff] %vm214_vm0, %v256_v0  ;;  %274 = vst.msk [vmem:[#allocation2 + $0x21] sm:$0xff] %vm214_vm0, %v257_v1 }
  0x6c   : > { %275 = vst.msk [vmem:[#allocation2 + $0x31] sm:$0xff] %vm214_vm0, %v258_v2  ;;  %276 = vst.msk [vmem:[#allocation2 + $0x41] sm:$0xff] %vm214_vm0, %v259_v4 }
  0x6d   : > { %277 = vst.msk [vmem:[#allocation2 + $0x51] sm:$0xff] %vm214_vm0, %v260_v5  ;;  %278 = vst.msk [vmem:[#allocation2 + $0x61] sm:$0xff] %vm214_vm0, %v261_v6 }
  0x6e   : > { %279 = vst.msk [vmem:[#allocation2 + $0x71] sm:$0xff] %vm214_vm0, %v262_v7  ;;  %280 = vst.msk [vmem:[#allocation2 + $0x81] sm:$0xff] %vm214_vm0, %v263_v8 }
  0x6f   : > { %281 = vst.msk [vmem:[#allocation2 + $0xb1] sm:$0xff] %vm214_vm0, %v264_v9  ;;  %282 = vst.msk [vmem:[#allocation2 + $0xc1] sm:$0xff] %vm214_vm0, %v265_v10 }
  0x70   : > { %283 = vst.msk [vmem:[#allocation2 + $0xd1] sm:$0xff] %vm214_vm0, %v266_v11  ;;  %284 = vst.msk [vmem:[#allocation2 + $0xe1] sm:$0xff] %vm214_vm0, %v267_v12 }
  0x71   : > { %285 = vst.msk [vmem:[#allocation2 + $0xf1] sm:$0xff] %vm214_vm0, %v268_v13  ;;  %286 = vst.msk [vmem:[#allocation2 + $0x101] sm:$0xff] %vm214_vm0, %v269_v14 }
  0x72   : > { %287 = vst.msk [vmem:[#allocation2 + $0x111] sm:$0xff] %vm214_vm0, %v270_v15  ;;  %288 = vst.msk [vmem:[#allocation2 + $0x121] sm:$0xff] %vm214_vm0, %v271_v16 }
  0x73 PF: > { %v2145_v17 = vld [vmem:[%s3061_s29 + $0x78] sm:$0xff]  ;;  %v2144_v18 = vld [vmem:[%s3061_s29 + $0x70] sm:$0xff]  ;;  %v2143_v19 = vld [vmem:[%s3061_s29 + $0x68] sm:$0xff]  ;;  %vm520_vm2 = vcmask 523264   ;;  %v289_v3 = vlaneseq  ;;  %p2299_p8 = scmp.ne.s32.totalorder %s2956_s16, 7 }
  0x74   : > { %2750 = vmatprep.subr.mxu1 %v2145_v17  ;;  %2470 = vmatprep.subr.mxu0 %v2145_v17  ;;  %v2142_v20 = vld [vmem:[%s3061_s29 + $0x60] sm:$0xff]  ;;  %v2141_v21 = vld [vmem:[%s3061_s29 + $0x58] sm:$0xff]  ;;  %v2140_v22 = vld [vmem:[%s3061_s29 + $0x50] sm:$0xff] }
  0x75   : > { %2758 = vmatpush3.msra.mxu1 %v2145_v17  ;;  %2471 = vmatpush3.msra.mxu0 %v2145_v17  ;;  %v2139_v23 = vld [vmem:[%s3061_s29 + $0x48] sm:$0xff]  ;;  %v2138_v24 = vld [vmem:[%s3061_s29 + $0x40] sm:$0xff]  ;;  %v510_v28 = vld [vmem:[%s3061_s29 + $0x38] sm:$0xff]  ;;  %v290_v6 = vshrl.u32 %v289_v3, 7 }
  0x76   : > { %2751 = vmatprep.subr.mxu1 %v2144_v18  ;;  %2472 = vmatprep.subr.mxu0 %v2144_v18  ;;  %v318_v25 = vld [vmem:[#allocation2 + $0xa1] sm:$0xff]  ;;  %v3186_v27 = vld [vmem:[#allocation2 + $0xb1] sm:$0xff] }
  0x77   : > { %2759 = vmatpush3.msra.mxu1 %v2144_v18  ;;  %2473 = vmatpush3.msra.mxu0 %v2144_v18  ;;  %v310_v26 = vld [vmem:[#allocation2 + $0x1] sm:$0xff]  ;;  %v3190_v29 = vld [vmem:[#allocation2 + $0x11] sm:$0xff]  ;;  %v291_v9 = vand.u32 1, %v290_v6 }
  0x78   : > { %2752 = vmatprep.subr.mxu1 %v2143_v19  ;;  %2474 = vmatprep.subr.mxu0 %v2143_v19  ;;  %v2185_v30 = vld [vmem:[%s3061_s29 + $0xb8] sm:$0xff]  ;;  %v509_v31 = vld [vmem:[%s3061_s29 + $0x30] sm:$0xff]  ;;  %v3197_v32 = vld [vmem:[#allocation2 + $0xc1] sm:$0xff] }
  0x79   : > { %2760 = vmatpush3.msra.mxu1 %v2143_v19  ;;  %2475 = vmatpush3.msra.mxu0 %v2143_v19  ;;  %v2184_v33 = vld [vmem:[%s3061_s29 + $0xb0] sm:$0xff]  ;;  %v3202_v34 = vld [vmem:[#allocation2 + $0x21] sm:$0xff]  ;;  %v506_v44 = vld [vmem:[%s3061_s29 + $0x18] sm:$0xff]  ;;  %vm3305_vm3 = vcmp.eq.s32.totalorder %v291_v9, 0 }
  0x7a   : > { %2753 = vmatprep.subr.mxu1 %v2142_v20  ;;  %2476 = vmatprep.subr.mxu0 %v2142_v20  ;;  %v3204_v35 = vld [vmem:[#allocation2 + $0xd1] sm:$0xff]  ;;  %v508_v36 = vld [vmem:[%s3061_s29 + $0x28] sm:$0xff]  ;;  %v507_v39 = vld [vmem:[%s3061_s29 + $0x20] sm:$0xff] }
  0x7b   : > { %2761 = vmatpush3.msra.mxu1 %v2142_v20  ;;  %2477 = vmatpush3.msra.mxu0 %v2142_v20  ;;  %v3209_v37 = vld [vmem:[#allocation2 + $0x31] sm:$0xff]  ;;  %v2183_v38 = vld [vmem:[%s3061_s29 + $0xa8] sm:$0xff]  ;;  %v2182_v41 = vld [vmem:[%s3061_s29 + $0xa0] sm:$0xff] }
  0x7c   : > { %2754 = vmatprep.subr.mxu1 %v2141_v21  ;;  %2478 = vmatprep.subr.mxu0 %v2141_v21  ;;  %v3217_v40 = vld [vmem:[#allocation2 + $0xe1] sm:$0xff]  ;;  %v3222_v43 = vld [vmem:[#allocation2 + $0xf1] sm:$0xff] }
  0x7d   : > { %2762 = vmatpush3.msra.mxu1 %v2141_v21  ;;  %2479 = vmatpush3.msra.mxu0 %v2141_v21  ;;  %v314_v42 = vld [vmem:[#allocation2 + $0x41] sm:$0xff]  ;;  %v315_v45 = vld [vmem:[#allocation2 + $0x51] sm:$0xff] }
  0x7e   : > { %2755 = vmatprep.subr.mxu1 %v2140_v22  ;;  %2480 = vmatprep.subr.mxu0 %v2140_v22  ;;  %v2181_v46 = vld [vmem:[%s3061_s29 + $0x98] sm:$0xff]  ;;  %v505_v47 = vld [vmem:[%s3061_s29 + $0x10] sm:$0xff]  ;;  %v3232_v48 = vld [vmem:[#allocation2 + $0x101] sm:$0xff] }
  0x7f   : > { %2763 = vmatpush3.msra.mxu1 %v2140_v22  ;;  %2481 = vmatpush3.msra.mxu0 %v2140_v22  ;;  %v2180_v49 = vld [vmem:[%s3061_s29 + $0x90] sm:$0xff]  ;;  %v316_v50 = vld [vmem:[#allocation2 + $0x61] sm:$0xff]  ;;  %v2209_v57 = vld [vmem:[%s3061_s29 + $0xf8] sm:$0xff] }
  0x80   : > { %2756 = vmatprep.subr.mxu1 %v2139_v23  ;;  %2482 = vmatprep.subr.mxu0 %v2139_v23  ;;  %v3236_v51 = vld [vmem:[#allocation2 + $0x111] sm:$0xff]  ;;  %v504_v52 = vld [vmem:[%s3061_s29 + $0x8] sm:$0xff]  ;;  %v503_v55 = vld [vmem:[%s3061_s29] sm:$0xff] }
  0x81   : > { %2764 = vmatpush3.msra.mxu1 %v2139_v23  ;;  %2483 = vmatpush3.msra.mxu0 %v2139_v23  ;;  %v317_v53 = vld [vmem:[#allocation2 + $0x71] sm:$0xff]  ;;  %v2179_v54 = vld [vmem:[%s3061_s29 + $0x88] sm:$0xff]  ;;  %v2178_v56 = vld [vmem:[%s3061_s29 + $0x80] sm:$0xff] }
  0x82   : > { %2757 = vmatprep.subr.mxu1 %v2138_v24  ;;  %2484 = vmatprep.subr.mxu0 %v2138_v24  ;;  %v2233_v58 = vld [vmem:[%s3061_s29 + $0x138] sm:$0xff]  ;;  %v2208_v59 = vld [vmem:[%s3061_s29 + $0xf0] sm:$0xff]  ;;  %v2207_v61 = vld [vmem:[%s3061_s29 + $0xe8] sm:$0xff] }
  0x83   : > { %2765 = vmatpush3.msra.mxu1 %v2138_v24  ;;  %2498 = vmatprep.mubr.msk.f32.mxu1 %vm520_vm2, %v318_v25  ;;  %v2232_v60 = vld [vmem:[%s3061_s29 + $0x130] sm:$0xff]  ;;  %v2231_v62 = vld [vmem:[%s3061_s29 + $0x128] sm:$0xff]  ;;  %v2206_v0 = vld [vmem:[%s3061_s29 + $0xe0] sm:$0xff] }
  0x84   : > { %2485 = vmatpush3.msra.mxu0 %v2138_v24  ;;  %2486 = vmatprep.mubr.msk.f32.mxu0 %vm520_vm2, %v310_v26  ;;  %v301_v63 = vld [vmem:[#allocation2 + $0x81] sm:$0xff]  ;;  %v334_v1 = vld [vmem:[#allocation2 + $0x91] sm:$0xff] }
  0x85   : > { %2499 = vmatmul.mubr.msk.f32.vlgmr.msra.gmra.mxu1 %vm520_vm2, %v3186_v27  ;;  %2510 = vmatprep.subr.mxu1 %v510_v28  ;;  %v2230_v2 = vld [vmem:[%s3061_s29 + $0x120] sm:$0xff]  ;;  %v2205_v4 = vld [vmem:[%s3061_s29 + $0xd8] sm:$0xff]  ;;  %v2204_v7 = vld [vmem:[%s3061_s29 + $0xd0] sm:$0xff] }
  0x86   : > { %2487 = vmatmul.mubr.msk.f32.vlgmr.msra.gmra.mxu0 %vm520_vm2, %v3190_v29  ;;  %2511 = vmatpush3.msra.mxu1 %v510_v28  ;;  %v2229_v5 = vld [vmem:[%s3061_s29 + $0x118] sm:$0xff]  ;;  %v2228_v8 = vld [vmem:[%s3061_s29 + $0x110] sm:$0xff]  ;;  %v2203_v10 = vld [vmem:[%s3061_s29 + $0xc8] sm:$0xff] }
  0x87   : > { %2550 = vmatprep.subr.mxu0 %v2185_v30  ;;  %2512 = vmatprep.subr.mxu1 %v509_v31  ;;  %v2227_v11 = vld [vmem:[%s3061_s29 + $0x108] sm:$0xff]  ;;  %v343_v14 = vld [vmem:[#allocation2] sm:$0xff]  ;;  %v359_v15 = vld [vmem:[#allocation2 + $0x10] sm:$0xff] }
  0x88   : > { %2551 = vmatpush3.msra.mxu0 %v2185_v30  ;;  %2501 = vmatprep.mubr.msk.f32.mxu1 %vm520_vm2, %v3197_v32  ;;  %v309_v12 = vld [vmem:[#allocation2 + $0x121] sm:$0xff]  ;;  %v342_v18 = vld [vmem:[#allocation2 + $0x131] sm:$0xff]  ;;  %v375_v20 = vsel %vm3305_vm3, %v343_v14, %v359_v15 }
  0x89   : > { %2513 = vmatpush3.msra.mxu1 %v509_v31  ;;  %2552 = vmatprep.subr.mxu0 %v2184_v33  ;;  %v2202_v16 = vld [vmem:[%s3061_s29 + $0xc0] sm:$0xff]  ;;  %v392_v21 = vld [vmem:[#allocation2 + $0x30] sm:$0xff]  ;;  %v2257_v23 = vld [vmem:[%s3061_s29 + $0x178] sm:$0xff] }
  0x8a   : > { %2489 = vmatprep.mubr.msk.f32.mxu0 %vm520_vm2, %v3202_v34  ;;  %2502 = vmatmul.mubr.msk.f32.gmra.mxu1 %vm520_vm2, %v3204_v35  ;;  %v360_v17 = vld [vmem:[#allocation2 + $0x20] sm:$0xff]  ;;  %v2281_v26 = vld [vmem:[%s3061_s29 + $0x1b8] sm:$0xff] }
  0x8b   : > { %2514 = vmatprep.subr.mxu1 %v508_v36  ;;  %2553 = vmatpush3.msra.mxu0 %v2184_v33  ;;  %v2226_v19 = vld [vmem:[%s3061_s29 + $0x100] sm:$0xff]  ;;  %v376_v22 = vsel %vm3305_vm3, %v359_v15, %v360_v17  ;;  %v408_v25 = vsel %vm3305_vm3, %v360_v17, %v392_v21  ;;  %v396_v33 = vld [vmem:[#allocation2 + $0x70] sm:$0xff] }
  0x8c   : > { %2490 = vmatmul.mubr.msk.f32.gmra.mxu0 %vm520_vm2, %v3209_v37  ;;  %2515 = vmatpush3.msra.mxu1 %v508_v36  ;;  %v362_v24 = vld [vmem:[#allocation2 + $0x40] sm:$0xff]  ;;  %v474_v17 = vld [vmem:[#allocation2 + $0x52] sm:$0xff] }
  0x8d   : > { %2554 = vmatprep.subr.mxu0 %v2183_v38  ;;  %2516 = vmatprep.subr.mxu1 %v507_v39  ;;  %v378_v28 = vsel %vm3305_vm3, %v392_v21, %v362_v24  ;;  %v364_v30 = vld [vmem:[#allocation2 + $0x60] sm:$0xff]  ;;  %v476_v21 = vld [vmem:[#allocation2 + $0x72] sm:$0xff] }
  0x8e   : > { %2555 = vmatpush3.msra.mxu0 %v2183_v38  ;;  %2504 = vmatprep.mubr.msk.f32.mxu1 %vm520_vm2, %v3217_v40  ;;  %v366_v36 = vld [vmem:[#allocation2 + $0x80] sm:$0xff]  ;;  %v2279_v38 = vld [vmem:[%s3061_s29 + $0x1a8] sm:$0xff] }
  0x8f   : > { %2517 = vmatpush3.msra.mxu1 %v507_v39  ;;  %2556 = vmatprep.subr.mxu0 %v2182_v41  ;;  %v398_v39 = vld [vmem:[#allocation2 + $0x90] sm:$0xff]  ;;  %v2250_v6 = vld [vmem:[%s3061_s29 + $0x140] sm:$0xff] }
  0x90   : > { %2492 = vmatprep.mubr.msk.f32.mxu0 %vm520_vm2, %v314_v42  ;;  %2505 = vmatmul.mubr.msk.f32.gmra.mxu1 %vm520_vm2, %v3222_v43  ;;  %v2274_v9 = vld [vmem:[%s3061_s29 + $0x180] sm:$0xff] }
  0x91   : > { %2518 = vmatprep.subr.mxu1 %v506_v44  ;;  %2557 = vmatpush3.msra.mxu0 %v2182_v41  ;;  %v351_v41 = vld [vmem:[#allocation2 + $0xa0] sm:$0xff] }
  0x92   : > { %2493 = vmatmul.mubr.msk.f32.gmra.mxu0 %vm520_vm2, %v315_v45  ;;  %2519 = vmatpush3.msra.mxu1 %v506_v44  ;;  %v368_v44 = vld [vmem:[#allocation2 + $0xc0] sm:$0xff] }
  0x93   : > { %2558 = vmatprep.subr.mxu0 %v2181_v46  ;;  %2520 = vmatprep.subr.mxu1 %v505_v47  ;;  %v442_v14 = vld [vmem:[#allocation2 + $0x42] sm:$0xff] }
  0x94   : > { %2559 = vmatpush3.msra.mxu0 %v2181_v46  ;;  %2507 = vmatprep.mubr.msk.f32.mxu1 %vm520_vm2, %v3232_v48  ;;  %v2278_v46 = vld [vmem:[%s3061_s29 + $0x1a0] sm:$0xff] }
  0x95   : > { %2521 = vmatpush3.msra.mxu1 %v505_v47  ;;  %2560 = vmatprep.subr.mxu0 %v2180_v49 }
  0x96   : > { %2495 = vmatprep.mubr.msk.f32.mxu0 %vm520_vm2, %v316_v50  ;;  %2508 = vmatmul.mubr.msk.f32.gmra.mxu1 %vm520_vm2, %v3236_v51 }
  0x97   : > { %2522 = vmatprep.subr.mxu1 %v504_v52  ;;  %2561 = vmatpush3.msra.mxu0 %v2180_v49 }
  0x98   : > { %2496 = vmatmul.mubr.msk.f32.gmra.mxu0 %vm520_vm2, %v317_v53  ;;  %2523 = vmatpush3.msra.mxu1 %v504_v52 }
  0x99   : > { %2562 = vmatprep.subr.mxu0 %v2179_v54  ;;  %2524 = vmatprep.subr.mxu1 %v503_v55 }
  0x9a   : > { %2563 = vmatpush3.msra.mxu0 %v2179_v54  ;;  %2525 = vmatpush3.msra.mxu1 %v503_v55  ;;  %v402_v54 = vld [vmem:[#allocation2 + $0xf0] sm:$0xff] }
  0x9b   : > { %2526 = vmatprep.mubr.msk.f32.mxu1 %vm520_vm2, %v3190_v29  ;;  %2564 = vmatprep.subr.mxu0 %v2178_v56  ;;  %v2256_v29 = vld [vmem:[%s3061_s29 + $0x170] sm:$0xff] }
  0x9c   : > { %2527 = vmatmul.mubr.msk.f32.vlgmr.msra.gmra.mxu1 %vm520_vm2, %v3202_v34  ;;  %2565 = vmatpush3.msra.mxu0 %v2178_v56  ;;  %v2252_v56 = vld [vmem:[%s3061_s29 + $0x150] sm:$0xff] }
  0x9d   : > { %2566 = vmatprep.mubr.msk.f32.mxu0 %vm520_vm2, %v3202_v34  ;;  %2590 = vmatprep.subr.mxu1 %v2209_v57 }
  0x9e   : > { %2567 = vmatmul.mubr.msk.f32.vlgmr.msra.gmra.mxu0 %vm520_vm2, %v3209_v37  ;;  %2591 = vmatpush3.msra.mxu1 %v2209_v57  ;;  %v372_v57 = vld [vmem:[#allocation2 + $0x100] sm:$0xff] }
  0x9f   : > { %2630 = vmatprep.subr.mxu0 %v2233_v58  ;;  %2529 = vmatprep.mubr.msk.f32.mxu1 %vm520_vm2, %v3209_v37  ;;  %v412_v37 = vsel %vm3305_vm3, %v364_v30, %v396_v33 }
  0xa0   : > { %2631 = vmatpush3.msra.mxu0 %v2233_v58  ;;  %2530 = vmatmul.mubr.msk.f32.gmra.mxu1 %vm520_vm2, %v314_v42 }
  0xa1   : > { %2569 = vmatprep.mubr.msk.f32.mxu0 %vm520_vm2, %v314_v42  ;;  %2592 = vmatprep.subr.mxu1 %v2208_v59  ;;  %v367_v42 = vld [vmem:[#allocation2 + $0xb0] sm:$0xff] }
  0xa2   : > { %2570 = vmatmul.mubr.msk.f32.gmra.mxu0 %vm520_vm2, %v315_v45  ;;  %2593 = vmatpush3.msra.mxu1 %v2208_v59  ;;  %v383_v47 = vsel %vm3305_vm3, %v351_v41, %v367_v42  ;;  %v384_v49 = vsel %vm3305_vm3, %v367_v42, %v368_v44  ;;  %v2276_v59 = vld [vmem:[%s3061_s29 + $0x190] sm:$0xff]  ;;  %v454_v41 = vld [vmem:[#allocation2 + $0x122] sm:$0xff] }
  0xa3   : > { %2632 = vmatprep.subr.mxu0 %v2232_v60  ;;  %2532 = vmatprep.mubr.msk.f32.mxu1 %vm520_vm2, %v315_v45  ;;  %v414_v45 = vsel %vm3305_vm3, %v366_v36, %v398_v39 }
  0xa4   : > { %2633 = vmatpush3.msra.mxu0 %v2232_v60  ;;  %2533 = vmatmul.mubr.msk.f32.gmra.mxu1 %vm520_vm2, %v316_v50  ;;  %v404_v60 = vld [vmem:[#allocation2 + $0x110] sm:$0xff] }
  0xa5   : > { %2572 = vmatprep.mubr.msk.f32.mxu0 %vm520_vm2, %v316_v50  ;;  %2594 = vmatprep.subr.mxu1 %v2207_v61  ;;  %v2253_v50 = vld [vmem:[%s3061_s29 + $0x158] sm:$0xff] }
  0xa6   : > { %2573 = vmatmul.mubr.msk.f32.gmra.mxu0 %vm520_vm2, %v317_v53  ;;  %2595 = vmatpush3.msra.mxu1 %v2207_v61  ;;  %v388_v61 = vsel %vm3305_vm3, %v402_v54, %v372_v57 }
  0xa7   : > { %2634 = vmatprep.subr.mxu0 %v2231_v62  ;;  %2535 = vmatprep.mubr.msk.f32.mxu1 %vm520_vm2, %v317_v53  ;;  %v2277_v53 = vld [vmem:[%s3061_s29 + $0x198] sm:$0xff] }
  0xa8   : > { %2635 = vmatpush3.msra.mxu0 %v2231_v62  ;;  %2536 = vmatmul.mubr.msk.f32.gmra.mxu1 %vm520_vm2, %v301_v63  ;;  %v2251_v62 = vld [vmem:[%s3061_s29 + $0x148] sm:$0xff] }
  0xa9   : > { %2575 = vmatprep.mubr.msk.f32.mxu0 %vm520_vm2, %v301_v63  ;;  %2596 = vmatprep.subr.mxu1 %v2206_v0  ;;  %v374_v63 = vld [vmem:[#allocation2 + $0x120] sm:$0xff] }
  0xaa   : > { %2576 = vmatmul.mubr.msk.f32.gmra.mxu0 %vm520_vm2, %v334_v1  ;;  %2597 = vmatpush3.msra.mxu1 %v2206_v0  ;;  %v420_v0 = vsel %vm3305_vm3, %v372_v57, %v404_v60  ;;  %v2275_v1 = vld [vmem:[%s3061_s29 + $0x188] sm:$0xff]  ;;  %v390_v3 = vsel %vm3305_vm3, %v404_v60, %v374_v63 }
  0xab   : > { %2636 = vmatprep.subr.mxu0 %v2230_v2  ;;  %2538 = vmatprep.mubr.msk.f32.mxu1 %vm520_vm2, %v3186_v27  ;;  %v394_v27 = vld [vmem:[#allocation2 + $0x50] sm:$0xff] }
  0xac   : > { %2637 = vmatpush3.msra.mxu0 %v2230_v2  ;;  %2539 = vmatmul.mubr.msk.f32.gmra.mxu1 %vm520_vm2, %v3197_v32  ;;  %v410_v31 = vsel %vm3305_vm3, %v362_v24, %v394_v27  ;;  %v380_v34 = vsel %vm3305_vm3, %v394_v27, %v364_v30  ;;  %v406_v2 = vld [vmem:[#allocation2 + $0x130] sm:$0xff]  ;;  %v431_v24 = vld [vmem:[#allocation2 + $0xa2] sm:$0xff] }
  0xad   : > { %2578 = vmatprep.mubr.msk.f32.mxu0 %vm520_vm2, %v3197_v32  ;;  %2598 = vmatprep.subr.mxu1 %v2205_v4  ;;  %v2280_v32 = vld [vmem:[%s3061_s29 + $0x1b0] sm:$0xff] }
  0xae   : > { %2579 = vmatmul.mubr.msk.f32.gmra.mxu0 %vm520_vm2, %v3204_v35  ;;  %2599 = vmatpush3.msra.mxu1 %v2205_v4  ;;  %v423_v4 = vld [vmem:[#allocation2 + $0x2] sm:$0xff]  ;;  %v478_v27 = vld [vmem:[#allocation2 + $0x92] sm:$0xff] }
  0xaf   : > { %2638 = vmatprep.subr.mxu0 %v2229_v5  ;;  %2541 = vmatprep.mubr.msk.f32.mxu1 %vm520_vm2, %v3204_v35  ;;  %v2255_v35 = vld [vmem:[%s3061_s29 + $0x168] sm:$0xff] }
  0xb0   : > { %2639 = vmatpush3.msra.mxu0 %v2229_v5  ;;  %2542 = vmatmul.mubr.msk.f32.gmra.mxu1 %vm520_vm2, %v3217_v40  ;;  %v439_v5 = vld [vmem:[#allocation2 + $0x12] sm:$0xff] }
  0xb1   : > { %2581 = vmatprep.mubr.msk.f32.mxu0 %vm520_vm2, %v3217_v40  ;;  %2600 = vmatprep.subr.mxu1 %v2204_v7  ;;  %v382_v40 = vsel %vm3305_vm3, %v396_v33, %v366_v36  ;;  %v450_v33 = vld [vmem:[#allocation2 + $0xe2] sm:$0xff]  ;;  %v482_v36 = vld [vmem:[#allocation2 + $0xf2] sm:$0xff] }
  0xb2   : > { %2582 = vmatmul.mubr.msk.f32.gmra.mxu0 %vm520_vm2, %v3222_v43  ;;  %2601 = vmatpush3.msra.mxu1 %v2204_v7  ;;  %v440_v7 = vld [vmem:[#allocation2 + $0x22] sm:$0xff] }
  0xb3   : > { %2640 = vmatprep.subr.mxu0 %v2228_v8  ;;  %2544 = vmatprep.mubr.msk.f32.mxu1 %vm520_vm2, %v3222_v43  ;;  %v2254_v43 = vld [vmem:[%s3061_s29 + $0x160] sm:$0xff] }
  0xb4   : > { %2641 = vmatpush3.msra.mxu0 %v2228_v8  ;;  %2545 = vmatmul.mubr.msk.f32.gmra.mxu1 %vm520_vm2, %v3232_v48  ;;  %v422_v8 = vsel %vm3305_vm3, %v374_v63, %v406_v2 }
  0xb5   : > { %2584 = vmatprep.mubr.msk.f32.mxu0 %vm520_vm2, %v3232_v48  ;;  %2602 = vmatprep.subr.mxu1 %v2203_v10  ;;  %v400_v48 = vld [vmem:[#allocation2 + $0xd0] sm:$0xff] }
  0xb6   : > { %2585 = vmatmul.mubr.msk.f32.gmra.mxu0 %vm520_vm2, %v3236_v51  ;;  %2603 = vmatpush3.msra.mxu1 %v2203_v10  ;;  %v416_v52 = vsel %vm3305_vm3, %v368_v44, %v400_v48  ;;  %v455_v10 = vsel %vm3305_vm3, %v423_v4, %v439_v5  ;;  %v486_v44 = vld [vmem:[#allocation2 + $0x132] sm:$0xff] }
  0xb7   : > { %2642 = vmatprep.subr.mxu0 %v2227_v11  ;;  %2547 = vmatprep.mubr.msk.f32.mxu1 %vm520_vm2, %v3236_v51  ;;  %v370_v51 = vld [vmem:[#allocation2 + $0xe0] sm:$0xff] }
  0xb8   : > { %2643 = vmatpush3.msra.mxu0 %v2227_v11  ;;  %2548 = vmatmul.mubr.msk.f32.gmra.mxu1 %vm520_vm2, %v309_v12  ;;  %v386_v55 = vsel %vm3305_vm3, %v400_v48, %v370_v51  ;;  %v418_v58 = vsel %vm3305_vm3, %v370_v51, %v402_v54  ;;  %v472_v11 = vld [vmem:[#allocation2 + $0x32] sm:$0xff] }
  0xb9   : > { %2587 = vmatprep.mubr.msk.f32.mxu0 %vm520_vm2, %v309_v12  ;;  %2604 = vmatprep.subr.mxu1 %v2202_v16  ;;  %v456_v12 = vsel %vm3305_vm3, %v439_v5, %v440_v7  ;;  %v488_v15 = vsel %vm3305_vm3, %v440_v7, %v472_v11 }
  0xba   : > { %2588 = vmatmul.mubr.msk.f32.gmra.mxu0 %vm520_vm2, %v342_v18  ;;  %2605 = vmatpush3.msra.mxu1 %v2202_v16  ;;  %v458_v16 = vsel %vm3305_vm3, %v472_v11, %v442_v14  ;;  %v444_v18 = vld [vmem:[#allocation2 + $0x62] sm:$0xff] }
  0xbb   : > { %2644 = vmatprep.subr.mxu0 %v2226_v19  ;;  %2606 = vmatprep.mubr.msk.f32.mxu1 %vm520_vm2, %v375_v20  ;;  %v460_v20 = vsel %vm3305_vm3, %v474_v17, %v444_v18 }
  0xbc   : > { %2645 = vmatpush3.msra.mxu0 %v2226_v19  ;;  %2607 = vmatmul.mubr.msk.f32.vlgmr.msra.gmra.mxu1 %vm520_vm2, %v376_v22  ;;  %v490_v19 = vsel %vm3305_vm3, %v442_v14, %v474_v17 }
  0xbd   : > { %2646 = vmatprep.mubr.msk.f32.mxu0 %vm520_vm2, %v376_v22  ;;  %2670 = vmatprep.subr.mxu1 %v2257_v23  ;;  %v446_v22 = vld [vmem:[#allocation2 + $0x82] sm:$0xff] }
  0xbe   : > { %2647 = vmatmul.mubr.msk.f32.vlgmr.msra.gmra.mxu0 %vm520_vm2, %v408_v25  ;;  %2671 = vmatpush3.msra.mxu1 %v2257_v23  ;;  %v492_v23 = vsel %vm3305_vm3, %v444_v18, %v476_v21  ;;  %v494_v30 = vsel %vm3305_vm3, %v446_v22, %v478_v27 }
  0xbf   : > { %2710 = vmatprep.subr.mxu0 %v2281_v26  ;;  %2609 = vmatprep.mubr.msk.f32.mxu1 %vm520_vm2, %v408_v25  ;;  %v447_v25 = vld [vmem:[#allocation2 + $0xb2] sm:$0xff] }
  0xc0   : > { %2711 = vmatpush3.msra.mxu0 %v2281_v26  ;;  %2610 = vmatmul.mubr.msk.f32.gmra.mxu1 %vm520_vm2, %v378_v28  ;;  %v462_v26 = vsel %vm3305_vm3, %v476_v21, %v446_v22 }
  0xc1   : > { %2649 = vmatprep.mubr.msk.f32.mxu0 %vm520_vm2, %v378_v28  ;;  %2672 = vmatprep.subr.mxu1 %v2256_v29  ;;  %v448_v28 = vld [vmem:[#allocation2 + $0xc2] sm:$0xff] }
  0xc2   : > { %2650 = vmatmul.mubr.msk.f32.gmra.mxu0 %vm520_vm2, %v410_v31  ;;  %2673 = vmatpush3.msra.mxu1 %v2256_v29  ;;  %v463_v29 = vsel %vm3305_vm3, %v431_v24, %v447_v25 }
  0xc3   : > { %2712 = vmatprep.subr.mxu0 %v2280_v32  ;;  %2612 = vmatprep.mubr.msk.f32.mxu1 %vm520_vm2, %v410_v31  ;;  %v464_v31 = vsel %vm3305_vm3, %v447_v25, %v448_v28 }
  0xc4   : > { %2713 = vmatpush3.msra.mxu0 %v2280_v32  ;;  %2613 = vmatmul.mubr.msk.f32.gmra.mxu1 %vm520_vm2, %v380_v34  ;;  %v480_v32 = vld [vmem:[#allocation2 + $0xd2] sm:$0xff] }
  0xc5   : > { %2652 = vmatprep.mubr.msk.f32.mxu0 %vm520_vm2, %v380_v34  ;;  %2674 = vmatprep.subr.mxu1 %v2255_v35  ;;  %v496_v34 = vsel %vm3305_vm3, %v448_v28, %v480_v32 }
  0xc6   : > { %2653 = vmatmul.mubr.msk.f32.gmra.mxu0 %vm520_vm2, %v412_v37  ;;  %2675 = vmatpush3.msra.mxu1 %v2255_v35  ;;  %v466_v35 = vsel %vm3305_vm3, %v480_v32, %v450_v33 }
  0xc7   : > { %2714 = vmatprep.subr.mxu0 %v2279_v38  ;;  %2615 = vmatprep.mubr.msk.f32.mxu1 %vm520_vm2, %v412_v37  ;;  %v452_v37 = vld [vmem:[#allocation2 + $0x102] sm:$0xff] }
  0xc8   : > { %2715 = vmatpush3.msra.mxu0 %v2279_v38  ;;  %2616 = vmatmul.mubr.msk.f32.gmra.mxu1 %vm520_vm2, %v382_v40  ;;  %v498_v38 = vsel %vm3305_vm3, %v450_v33, %v482_v36  ;;  %v468_v39 = vsel %vm3305_vm3, %v482_v36, %v452_v37 }
  0xc9   : > { %2655 = vmatprep.mubr.msk.f32.mxu0 %vm520_vm2, %v382_v40  ;;  %2676 = vmatprep.subr.mxu1 %v2254_v43  ;;  %v484_v40 = vld [vmem:[#allocation2 + $0x112] sm:$0xff] }
  0xca   : > { %2656 = vmatmul.mubr.msk.f32.gmra.mxu0 %vm520_vm2, %v414_v45  ;;  %2677 = vmatpush3.msra.mxu1 %v2254_v43  ;;  %v500_v42 = vsel %vm3305_vm3, %v452_v37, %v484_v40  ;;  %v470_v43 = vsel %vm3305_vm3, %v484_v40, %v454_v41  ;;  %v502_v45 = vsel %vm3305_vm3, %v454_v41, %v486_v44 }
  0xcb   : > { %2716 = vmatprep.subr.mxu0 %v2278_v46  ;;  %2618 = vmatprep.mubr.msk.f32.mxu1 %vm520_vm2, %v383_v47 }
  0xcc   : > { %2717 = vmatpush3.msra.mxu0 %v2278_v46  ;;  %2619 = vmatmul.mubr.msk.f32.gmra.mxu1 %vm520_vm2, %v384_v49 }
  0xcd   : > { %2658 = vmatprep.mubr.msk.f32.mxu0 %vm520_vm2, %v384_v49  ;;  %2678 = vmatprep.subr.mxu1 %v2253_v50 }
  0xce   : > { %2659 = vmatmul.mubr.msk.f32.gmra.mxu0 %vm520_vm2, %v416_v52  ;;  %2679 = vmatpush3.msra.mxu1 %v2253_v50 }
  0xcf   : > { %2718 = vmatprep.subr.mxu0 %v2277_v53  ;;  %2621 = vmatprep.mubr.msk.f32.mxu1 %vm520_vm2, %v416_v52 }
  0xd0   : > { %2719 = vmatpush3.msra.mxu0 %v2277_v53  ;;  %2622 = vmatmul.mubr.msk.f32.gmra.mxu1 %vm520_vm2, %v386_v55 }
  0xd1   : > { %2661 = vmatprep.mubr.msk.f32.mxu0 %vm520_vm2, %v386_v55  ;;  %2680 = vmatprep.subr.mxu1 %v2252_v56 }
  0xd2   : > { %2662 = vmatmul.mubr.msk.f32.gmra.mxu0 %vm520_vm2, %v418_v58  ;;  %2681 = vmatpush3.msra.mxu1 %v2252_v56 }
  0xd3   : > { %2720 = vmatprep.subr.mxu0 %v2276_v59  ;;  %2624 = vmatprep.mubr.msk.f32.mxu1 %vm520_vm2, %v418_v58 }
  0xd4   : > { %2721 = vmatpush3.msra.mxu0 %v2276_v59  ;;  %2625 = vmatmul.mubr.msk.f32.gmra.mxu1 %vm520_vm2, %v388_v61 }
  0xd5   : > { %2664 = vmatprep.mubr.msk.f32.mxu0 %vm520_vm2, %v388_v61  ;;  %2682 = vmatprep.subr.mxu1 %v2251_v62 }
  0xd6   : > { %2665 = vmatmul.mubr.msk.f32.gmra.mxu0 %vm520_vm2, %v420_v0  ;;  %2683 = vmatpush3.msra.mxu1 %v2251_v62 }
  0xd7   : > { %2722 = vmatprep.subr.mxu0 %v2275_v1  ;;  %2627 = vmatprep.mubr.msk.f32.mxu1 %vm520_vm2, %v420_v0 }
  0xd8   : > { %2723 = vmatpush3.msra.mxu0 %v2275_v1  ;;  %2628 = vmatmul.mubr.msk.f32.gmra.mxu1 %vm520_vm2, %v390_v3 }
  0xd9   : > { %2667 = vmatprep.mubr.msk.f32.mxu0 %vm520_vm2, %v390_v3  ;;  %2684 = vmatprep.subr.mxu1 %v2250_v6 }
  0xda   : > { %2668 = vmatmul.mubr.msk.f32.gmra.mxu0 %vm520_vm2, %v422_v8  ;;  %2685 = vmatpush3.msra.mxu1 %v2250_v6 }
  0xdb   : > { %2724 = vmatprep.subr.mxu0 %v2274_v9  ;;  %2686 = vmatprep.mubr.msk.f32.mxu1 %vm520_vm2, %v455_v10 }
  0xdc   : > { %2725 = vmatpush3.msra.mxu0 %v2274_v9  ;;  %2687 = vmatmul.mubr.msk.f32.vlgmr.msra.gmra.mxu1 %vm520_vm2, %v456_v12 }
  0xdd   : > { %2726 = vmatprep.mubr.msk.f32.mxu0 %vm520_vm2, %v456_v12  ;;  %2689 = vmatprep.mubr.msk.f32.mxu1 %vm520_vm2, %v488_v15 }
  0xde   : > { %2727 = vmatmul.mubr.msk.f32.vlgmr.msra.gmra.mxu0 %vm520_vm2, %v488_v15 }
  0xdf   : > { %2729 = vmatprep.mubr.msk.f32.mxu0 %vm520_vm2, %v458_v16 }
  0xe0   : > { %2690 = vmatmul.mubr.msk.f32.gmra.mxu1 %vm520_vm2, %v458_v16 }
  0xe1   : > { %2692 = vmatprep.mubr.msk.f32.mxu1 %vm520_vm2, %v490_v19 }
  0xe2   : > { %2730 = vmatmul.mubr.msk.f32.gmra.mxu0 %vm520_vm2, %v490_v19 }
  0xe3   : > { %2732 = vmatprep.mubr.msk.f32.mxu0 %vm520_vm2, %v460_v20 }
  0xe4   : > { %2693 = vmatmul.mubr.msk.f32.gmra.mxu1 %vm520_vm2, %v460_v20 }
  0xe5   : > { %2695 = vmatprep.mubr.msk.f32.mxu1 %vm520_vm2, %v492_v23 }
  0xe6   : > { %2733 = vmatmul.mubr.msk.f32.gmra.mxu0 %vm520_vm2, %v492_v23 }
  0xe7   : > { %2735 = vmatprep.mubr.msk.f32.mxu0 %vm520_vm2, %v462_v26 }
  0xe8   : > { %2696 = vmatmul.mubr.msk.f32.gmra.mxu1 %vm520_vm2, %v462_v26 }
  0xe9   : > { %2698 = vmatprep.mubr.msk.f32.mxu1 %vm520_vm2, %v463_v29 }
  0xea   : > { %2736 = vmatmul.mubr.msk.f32.gmra.mxu0 %vm520_vm2, %v494_v30 }
  0xeb   : > { %2738 = vmatprep.mubr.msk.f32.mxu0 %vm520_vm2, %v464_v31 }
  0xec   : > { %2699 = vmatmul.mubr.msk.f32.gmra.mxu1 %vm520_vm2, %v464_v31 }
  0xed   : > { %2701 = vmatprep.mubr.msk.f32.mxu1 %vm520_vm2, %v496_v34 }
  0xee   : > { %2739 = vmatmul.mubr.msk.f32.gmra.mxu0 %vm520_vm2, %v496_v34 }
  0xef   : > { %2741 = vmatprep.mubr.msk.f32.mxu0 %vm520_vm2, %v466_v35 }
  0xf0   : > { %2702 = vmatmul.mubr.msk.f32.gmra.mxu1 %vm520_vm2, %v466_v35 }
  0xf1   : > { %2704 = vmatprep.mubr.msk.f32.mxu1 %vm520_vm2, %v498_v38 }
  0xf2   : > { %2742 = vmatmul.mubr.msk.f32.gmra.mxu0 %vm520_vm2, %v498_v38 }
  0xf3   : > { %2744 = vmatprep.mubr.msk.f32.mxu0 %vm520_vm2, %v468_v39 }
  0xf4   : > { %2705 = vmatmul.mubr.msk.f32.gmra.mxu1 %vm520_vm2, %v468_v39 }
  0xf5   : > { %2707 = vmatprep.mubr.msk.f32.mxu1 %vm520_vm2, %v500_v42 }
  0xf6   : > { %2745 = vmatmul.mubr.msk.f32.gmra.mxu0 %vm520_vm2, %v500_v42 }
  0xf7   : > { %2747 = vmatprep.mubr.msk.f32.mxu0 %vm520_vm2, %v470_v43 }
  0xf8   : > { %2708 = vmatmul.mubr.msk.f32.gmra.mxu1 %vm520_vm2, %v470_v43 }
  0xfa   : > { %2748 = vmatmul.mubr.msk.f32.gmra.mxu0 %vm520_vm2, %v502_v45 }
 0x145   : > { %v3470_v46 = vpop.f32.mrf.mxu1 }
 0x146   : > { %v3472_v47 = vpop.f32.mrf.mxu0 }
 0x147   : > { %v3474_v48 = vpop.f32.mrf.mxu1 }
 0x148   : > { %v3476_v49 = vpop.f32.mrf.mxu0 }
 0x14a   : > { %v3478_v50 = vpop.f32.mrf.mxu1 }
 0x14c   : > { %v3480_v51 = vpop.f32.mrf.mxu0  ;;  %v3482_v52 = vpop.f32.mrf.mxu1 }
 0x14e   : > { %v3484_v13 = vpop.f32.mrf.mxu0 }
 0x150   : > { %v3486_v53 = vpop.f32.mrf.mxu1 }
 0x152   : > { %v3488_v54 = vpop.f32.mrf.mxu0  ;;  %v3490_v55 = vpop.f32.mrf.mxu1 }
 0x153   : > { %3839 = vst [vmem:[#allocation9_spill] sm:$0xff] %v3490_v55 }
 0x154   : > { %v3492_v56 = vpop.f32.mrf.mxu0 }
 0x156   : > { %v3494_v57 = vpop.f32.mrf.mxu1 }
 0x157   : > { %3840 = vst [vmem:[#allocation10_spill] sm:$0xff] %v3494_v57 }
 0x158   : > { %v3496_v58 = vpop.f32.mrf.mxu0  ;;  %v3498_v59 = vpop.f32.mrf.mxu1 }
 0x159   : > { %3841 = vst [vmem:[#allocation11_spill] sm:$0xff] %v3498_v59 }
 0x15a   : > { %v3500_v60 = vpop.f32.mrf.mxu0 }
 0x15c   : > { %v2528_v61 = vpop.f32.mrf.mxu1 }
 0x15e   : > { %v2568_v62 = vpop.f32.mrf.mxu0  ;;  %v828_v63 = vpop.f32.mrf.mxu1 }
 0x160   : > { %v1030_v0 = vpop.f32.mrf.mxu0  ;;  %v2531_v1 = vpop.f32.mrf.mxu1 }
 0x162   : > { %v3502_v2 = vpop.f32.mrf.mxu0  ;;  %v838_v3 = vpop.f32.mrf.mxu1 }
 0x164   : > { %v3504_v4 = vpop.f32.mrf.mxu0  ;;  %v2534_v5 = vpop.f32.mrf.mxu1 }
 0x166   : > { %v3506_v6 = vpop.f32.mrf.mxu0  ;;  %v848_v7 = vpop.f32.mrf.mxu1 }
 0x168   : > { %v3508_v8 = vpop.f32.mrf.mxu0  ;;  %v3510_v9 = vpop.f32.mrf.mxu1 }
 0x16a   : > { %v3512_v10 = vpop.f32.mrf.mxu0  ;;  %v3514_v11 = vpop.f32.mrf.mxu1 }
 0x16c   : > { %v3516_v12 = vpop.f32.mrf.mxu0  ;;  %v3518_v14 = vpop.f32.mrf.mxu1 }
 0x16e   : > { %v3520_v15 = vpop.f32.mrf.mxu0  ;;  %v3522_v16 = vpop.f32.mrf.mxu1 }
 0x170   : > { %v3524_v17 = vpop.f32.mrf.mxu0  ;;  %v3526_v18 = vpop.f32.mrf.mxu1 }
 0x172   : > { %v3528_v19 = vpop.f32.mrf.mxu0  ;;  %v3530_v20 = vpop.f32.mrf.mxu1 }
 0x174   : > { %v3532_v21 = vpop.f32.mrf.mxu0  ;;  %v3534_v22 = vpop.f32.mrf.mxu1 }
 0x175   : > { %3842 = vst [vmem:[#allocation12_spill] sm:$0xff] %v3532_v21 }
 0x176   : > { %v3536_v23 = vpop.f32.mrf.mxu0  ;;  %v3538_v24 = vpop.f32.mrf.mxu1 }
 0x177   : > { %3843 = vst [vmem:[#allocation13_spill] sm:$0xff] %v3536_v23  ;;  %3844 = vst [vmem:[#allocation14_spill] sm:$0xff] %v3538_v24  ;;  %v829_v24 = vadd.f32 %v828_v63, %v3476_v49 }
 0x178   : > { %v3540_v25 = vpop.f32.mrf.mxu0  ;;  %v3542_v26 = vpop.f32.mrf.mxu1 }
 0x179   : > { %3845 = vst [vmem:[#allocation15_spill] sm:$0xff] %v3540_v25  ;;  %3846 = vst [vmem:[#allocation16_spill] sm:$0xff] %v3542_v26  ;;  %v834_v26 = vadd.f32 %v2528_v61, %v3472_v47  ;;  %v839_v47 = vadd.f32 %v838_v3, %v3484_v13 }
 0x17a   : > { %v3544_v27 = vpop.f32.mrf.mxu0  ;;  %v3546_v28 = vpop.f32.mrf.mxu1 }
 0x17b   : > { %3847 = vst [vmem:[#allocation17_spill] sm:$0xff] %v3544_v27  ;;  %3848 = vst [vmem:[#allocation18_spill] sm:$0xff] %v3546_v28 }
 0x17c   : > { %v3548_v29 = vpop.f32.mrf.mxu0  ;;  %v2608_v30 = vpop.f32.mrf.mxu1 }
 0x17d   : > { %3849 = vst [vmem:[#allocation19_spill] sm:$0xff] %v3548_v29 }
 0x17e   : > { %v2648_v31 = vpop.f32.mrf.mxu0  ;;  %v1248_v32 = vpop.f32.mrf.mxu1 }
 0x180   : > { %v1466_v33 = vpop.f32.mrf.mxu0  ;;  %v2611_v34 = vpop.f32.mrf.mxu1 }
 0x182   : > { %v2651_v35 = vpop.f32.mrf.mxu0  ;;  %v1258_v36 = vpop.f32.mrf.mxu1 }
 0x184   : > { %v1476_v37 = vpop.f32.mrf.mxu0  ;;  %v2614_v38 = vpop.f32.mrf.mxu1 }
 0x186   : > { %v3550_v39 = vpop.f32.mrf.mxu0  ;;  %v1268_v40 = vpop.f32.mrf.mxu1 }
 0x188   : > { %v3552_v41 = vpop.f32.mrf.mxu0  ;;  %v2617_v42 = vpop.f32.mrf.mxu1 }
 0x18a   : > { %v3554_v43 = vpop.f32.mrf.mxu0  ;;  %v3556_v44 = vpop.f32.mrf.mxu1 }
 0x18c   : > { %v3558_v45 = vpop.f32.mrf.mxu0  ;;  %v3560_v29 = vpop.f32.mrf.mxu1 }
 0x18d   : > { %3850 = vst [vmem:[#allocation20_spill] sm:$0xff] %v3558_v45  ;;  %v1110_v45 = vadd.f32 %v2568_v62, %v834_v26  ;;  %v849_v62 = vadd.f32 %v848_v7, %v3492_v56 }
 0x18e   : > { %v3562_v27 = vpop.f32.mrf.mxu0  ;;  %v3564_v28 = vpop.f32.mrf.mxu1 }
 0x18f   : > { %3851 = vst [vmem:[#allocation21_spill] sm:$0xff] %v3562_v27  ;;  %3852 = vst [vmem:[#allocation22_spill] sm:$0xff] %v3564_v28  ;;  %v844_v27 = vadd.f32 %v2531_v1, %v3480_v51  ;;  %v1328_v61 = vadd.f32 %v2608_v30, %v1110_v45  ;;  %v1113_v7 = vadd.f32 %v3508_v8, %v849_v62 }
 0x190   : > { %v3566_v59 = vpop.f32.mrf.mxu0  ;;  %v3568_v25 = vpop.f32.mrf.mxu1 }
 0x191   : > { %3853 = vst [vmem:[#allocation23_spill] sm:$0xff] %v3566_v59  ;;  %3854 = vst [vmem:[#allocation24_spill] sm:$0xff] %v3568_v25  ;;  %v1109_v25 = vadd.f32 %v1030_v0, %v829_v24  ;;  %v1112_v63 = vadd.f32 %v3502_v2, %v844_v27  ;;  %v1111_v0 = vadd.f32 %v3504_v4, %v839_v47 }
 0x192   : > { %v3571_v57 = vpop.f32.mrf.mxu0  ;;  %v3573_v23 = vpop.f32.mrf.mxu1  ;;  %v1546_v13 = vadd.f32 %v2648_v31, %v1328_v61  ;;  %v859_v27 = vadd.f32 %v3514_v11, %v3500_v60  ;;  %v3608_v31 = vld [vmem:[%s188_s27] ss:$0 sm:$0xff] }
 0x193   : > { %3855 = vst [vmem:[#allocation25_spill] sm:$0xff] %v3571_v57  ;;  %3856 = vst [vmem:[#allocation26_spill] sm:$0xff] %v3573_v23  ;;  %v854_v57 = vadd.f32 %v2534_v5, %v3488_v54  ;;  %v1330_v3 = vadd.f32 %v2611_v34, %v1112_v63  ;;  %v864_v5 = vadd.f32 %v3510_v9, %v3496_v58 }
 0x194   : > { %v3576_v55 = vpop.f32.mrf.mxu0  ;;  %v3578_v21 = vpop.f32.mrf.mxu1  ;;  %v1329_v26 = vadd.f32 %v1258_v36, %v1111_v0  ;;  %v1115_v45 = vadd.f32 %v3516_v12, %v859_v27  ;;  %v884_v12 = vadd.f32 %v3526_v18, %v3478_v50  ;;  %v879_v50 = vadd.f32 %v3530_v20, %v3482_v52  ;;  %v3858_v20 = vld [vmem:[#allocation20_spill] sm:$0xff] }
 0x195   : > { %3857 = vst [vmem:[#allocation27_spill] sm:$0xff] %v3576_v55  ;;  %v1327_v55 = vadd.f32 %v1248_v32, %v1109_v25  ;;  %v1114_v54 = vadd.f32 %v3506_v6, %v854_v57  ;;  %v1548_v6 = vadd.f32 %v2651_v35, %v1330_v3  ;;  %v1116_v9 = vadd.f32 %v3512_v10, %v864_v5 }
 0x196   : > { %v3581_v28 = vpop.f32.mrf.mxu0  ;;  %v3583_v59 = vpop.f32.mrf.mxu1  ;;  %v1547_v36 = vadd.f32 %v1476_v37, %v1329_v26  ;;  %v869_v35 = vadd.f32 %v3522_v16, %v3474_v48  ;;  %v1333_v48 = vadd.f32 %v3556_v44, %v1115_v45  ;;  %v894_v52 = vadd.f32 %v3534_v22, %v3486_v53  ;;  %v3861_v53 = vld [vmem:[#allocation9_spill] sm:$0xff]  ;;  %v3862_v22 = vld [vmem:[#allocation14_spill] sm:$0xff] }
 0x197   : > { %v1545_v25 = vadd.f32 %v1466_v33, %v1327_v55  ;;  %v1332_v30 = vadd.f32 %v2614_v38, %v1114_v54  ;;  %v874_v55 = vadd.f32 %v3518_v14, %v3470_v46  ;;  %v1331_v33 = vadd.f32 %v1268_v40, %v1113_v7 }
 0x198   : > { %v3587_v23 = vpop.f32.mrf.mxu0  ;;  %v3589_v49 = vpop.f32.mrf.mxu1  ;;  %v1334_v10 = vadd.f32 %v2617_v42, %v1116_v9  ;;  %v1117_v54 = vadd.f32 %v3524_v17, %v869_v35  ;;  %v889_v9 = vadd.f32 %v3862_v22, %v3861_v53 }
 0x199   : > { %v1550_v47 = vadd.f32 %v3550_v39, %v1332_v30  ;;  %v1118_v62 = vadd.f32 %v3520_v15, %v874_v55  ;;  %v1549_v0 = vadd.f32 %v3552_v41, %v1331_v33  ;;  %v3863_v55 = vld [vmem:[#allocation21_spill] sm:$0xff] }
 0x19a   : > { %v3593_v51 = vpop.f32.mrf.mxu0  ;;  %v3595_v1 = vpop.f32.mrf.mxu1  ;;  %v1552_v18 = vadd.f32 %v3554_v43, %v1334_v10  ;;  %v3859_v43 = vld [vmem:[#allocation22_spill] sm:$0xff]  ;;  %v3865_v10 = vld [vmem:[#allocation13_spill] sm:$0xff] }
 0x19b   : > { %v1336_v41 = vadd.f32 %v3560_v29, %v1118_v62  ;;  %v1551_v29 = vadd.f32 %v3858_v20, %v1333_v48  ;;  %v1335_v7 = vadd.f32 %v3859_v43, %v1117_v54  ;;  %v3868_v62 = vld [vmem:[#allocation23_spill] sm:$0xff] }
 0x19c   : > { %v3601_v24 = vpop.f32.mrf.mxu0  ;;  %v2688_v2 = vpop.f32.mrf.mxu1 }
 0x19d   : > { %v1764_v56 = vadd.f32 %v2688_v2, %v1546_v13  ;;  %v1554_v33 = vadd.f32 %v3863_v55, %v1336_v41 }
 0x19e   : > { %v2728_v4 = vpop.f32.mrf.mxu0  ;;  %v1684_v57 = vpop.f32.mrf.mxu1 }
 0x19f   : > { %v1982_v32 = vadd.f32 %v2728_v4, %v1764_v56  ;;  %v1763_v58 = vadd.f32 %v1684_v57, %v1545_v25  ;;  %v1120_v56 = vadd.f32 %v3528_v19, %v884_v12  ;;  %v1553_v12 = vadd.f32 %v3868_v62, %v1335_v7 }
 0x1a0   : > { %v1902_v34 = vpop.f32.mrf.mxu0  ;;  %v2691_v8 = vpop.f32.mrf.mxu1 }
 0x1a1   : > { %v3614_v60 = vadd.f32 %v3608_v31, %v1982_v32  ;;  %v1981_v11 = vadd.f32 %v1902_v34, %v1763_v58  ;;  %v1766_v38 = vadd.f32 %v2691_v8, %v1548_v6  ;;  %v3860_v32 = vld [vmem:[#allocation12_spill] sm:$0xff] }
 0x1a2   : > { %v2731_v61 = vpop.f32.mrf.mxu0  ;;  %v1694_v63 = vpop.f32.mrf.mxu1  ;;  %v1119_v58 = vadd.f32 %v3860_v32, %v879_v50  ;;  %v3864_v34 = vld [vmem:[#allocation24_spill] sm:$0xff]  ;;  %v3875_v32 = vld [vmem:[#allocation27_spill] sm:$0xff] }
 0x1a3   : > { %v2021_v46 = vmax.f32 %v3614_v60, 0.0  ;;  %v3622_v14 = vadd.f32 %v3608_v31, %v1981_v11  ;;  %v1984_v37 = vadd.f32 %v2731_v61, %v1766_v38  ;;  %v1765_v40 = vadd.f32 %v1694_v63, %v1547_v36  ;;  %v3866_v63 = vld [vmem:[#allocation10_spill] sm:$0xff] }
 0x1a4   : > { %v1912_v16 = vpop.f32.mrf.mxu0  ;;  %v2694_v39 = vpop.f32.mrf.mxu1  ;;  %v1338_v8 = vadd.f32 %v3864_v34, %v1120_v56  ;;  %v1122_v61 = vadd.f32 %v3865_v10, %v894_v52 }
 0x1a5   : > { %2037 = vst.msk [vmem:[#allocation2 + $0x21] sm:$0xff] %vm520_vm2, %v2021_v46  ;;  %v2020_v42 = vmax.f32 %v3622_v14, 0.0  ;;  %v3634_v13 = vadd.f32 %v3608_v31, %v1984_v37  ;;  %v1983_v3 = vadd.f32 %v1912_v16, %v1765_v40  ;;  %v1768_v15 = vadd.f32 %v2694_v39, %v1550_v47  ;;  %v3867_v37 = vld [vmem:[#allocation16_spill] sm:$0xff] }
 0x1a6   : > { %v2734_v44 = vpop.f32.mrf.mxu0  ;;  %v1704_v5 = vpop.f32.mrf.mxu1  ;;  %v904_v40 = vadd.f32 %v3867_v37, %v3866_v63  ;;  %v1340_v52 = vadd.f32 %v3578_v21, %v1122_v61 }
 0x1a7   : > { %2036 = vst.msk [vmem:[#allocation2 + $0x11] sm:$0xff] %vm520_vm2, %v2020_v42  ;;  %v2023_v2 = vmax.f32 %v3634_v13, 0.0  ;;  %v3646_v25 = vadd.f32 %v3608_v31, %v1983_v3  ;;  %v1986_v26 = vadd.f32 %v2734_v44, %v1768_v15  ;;  %v1767_v17 = vadd.f32 %v1704_v5, %v1549_v0  ;;  %v3869_v0 = vld [vmem:[#allocation26_spill] sm:$0xff]  ;;  %v3871_v44 = vld [vmem:[#allocation11_spill] sm:$0xff] }
 0x1a8   : > { %v1922_v27 = vpop.f32.mrf.mxu0  ;;  %v2697_v30 = vpop.f32.mrf.mxu1  ;;  %v1337_v48 = vadd.f32 %v3869_v0, %v1119_v58  ;;  %v3872_v5 = vld [vmem:[#allocation18_spill] sm:$0xff] }
 0x1a9   : > { %2039 = vst.msk [vmem:[#allocation2 + $0x41] sm:$0xff] %vm520_vm2, %v2023_v2  ;;  %v2022_v4 = vmax.f32 %v3646_v25, 0.0  ;;  %v3658_v57 = vadd.f32 %v3608_v31, %v1986_v26  ;;  %v1985_v6 = vadd.f32 %v1922_v27, %v1767_v17  ;;  %v1770_v19 = vadd.f32 %v2697_v30, %v1552_v18  ;;  %v3870_v18 = vld [vmem:[#allocation15_spill] sm:$0xff]  ;;  %v3873_v17 = vld [vmem:[#allocation25_spill] sm:$0xff] }
 0x1aa   : > { %v2737_v36 = vpop.f32.mrf.mxu0  ;;  %v1714_v11 = vpop.f32.mrf.mxu1  ;;  %v1121_v41 = vadd.f32 %v3870_v18, %v889_v9  ;;  %v899_v26 = vadd.f32 %v3872_v5, %v3871_v44  ;;  %v1556_v56 = vadd.f32 %v3873_v17, %v1338_v8  ;;  %v1555_v58 = vadd.f32 %v3875_v32, %v1337_v48  ;;  %v3876_v8 = vld [vmem:[#allocation19_spill] sm:$0xff] }
 0x1ab   : > { %2038 = vst.msk [vmem:[#allocation2 + $0x31] sm:$0xff] %vm520_vm2, %v2022_v4  ;;  %v2025_v38 = vmax.f32 %v3658_v57, 0.0  ;;  %v3670_v45 = vadd.f32 %v3608_v31, %v1985_v6  ;;  %v1988_v35 = vadd.f32 %v2737_v36, %v1770_v19  ;;  %v1769_v47 = vadd.f32 %v1714_v11, %v1551_v29  ;;  %v3874_v6 = vld [vmem:[#allocation17_spill] sm:$0xff] }
 0x1ac   : > { %v1932_v16 = vpop.f32.mrf.mxu0  ;;  %v2700_v39 = vpop.f32.mrf.mxu1  ;;  %v1124_v19 = vadd.f32 %v3874_v6, %v904_v40  ;;  %v1339_v53 = vadd.f32 %v3583_v59, %v1121_v41  ;;  %v1123_v36 = vadd.f32 %v3876_v8, %v899_v26  ;;  %v1558_v11 = vadd.f32 %v3581_v28, %v1340_v52 }
 0x1ad   : > { %2041 = vst.msk [vmem:[#allocation2 + $0x61] sm:$0xff] %vm520_vm2, %v2025_v38  ;;  %v2024_v3 = vmax.f32 %v3670_v45, 0.0  ;;  %v3682_v15 = vadd.f32 %v3608_v31, %v1988_v35  ;;  %v1987_v54 = vadd.f32 %v1932_v16, %v1769_v47  ;;  %v1772_v50 = vadd.f32 %v2700_v39, %v1554_v33 }
 0x1ae   : > { %v2740_v20 = vpop.f32.mrf.mxu0  ;;  %v1724_v29 = vpop.f32.mrf.mxu1  ;;  %v1342_v35 = vadd.f32 %v3589_v49, %v1124_v19  ;;  %v1557_v40 = vadd.f32 %v3587_v23, %v1339_v53  ;;  %v1341_v62 = vadd.f32 %v3595_v1, %v1123_v36 }
 0x1af   : > { %2040 = vst.msk [vmem:[#allocation2 + $0x51] sm:$0xff] %vm520_vm2, %v2024_v3  ;;  %v2027_v43 = vmax.f32 %v3682_v15, 0.0  ;;  %v3694_v7 = vadd.f32 %v3608_v31, %v1987_v54  ;;  %v1990_v27 = vadd.f32 %v2740_v20, %v1772_v50  ;;  %v1771_v30 = vadd.f32 %v1724_v29, %v1553_v12 }
 0x1b0   : > { %v1942_v21 = vpop.f32.mrf.mxu0  ;;  %v2703_v22 = vpop.f32.mrf.mxu1  ;;  %v1560_v39 = vadd.f32 %v3593_v51, %v1342_v35  ;;  %v1559_v44 = vadd.f32 %v3601_v24, %v1341_v62 }
 0x1b1   : > { %2043 = vst.msk [vmem:[#allocation2 + $0x81] sm:$0xff] %vm520_vm2, %v2027_v43  ;;  %v2026_v9 = vmax.f32 %v3694_v7, 0.0  ;;  %v3704_v55 = vadd.f32 %v3608_v31, %v1990_v27  ;;  %v1989_v33 = vadd.f32 %v1942_v21, %v1771_v30  ;;  %v1774_v34 = vadd.f32 %v2703_v22, %v1556_v56 }
 0x1b2   : > { %v2743_v59 = vpop.f32.mrf.mxu0  ;;  %v1734_v47 = vpop.f32.mrf.mxu1 }
 0x1b3   : > { %2042 = vst.msk [vmem:[#allocation2 + $0x71] sm:$0xff] %vm520_vm2, %v2026_v9  ;;  %v2029_v10 = vmax.f32 %v3704_v55, 0.0  ;;  %v2012_v61 = vadd.f32 %v3608_v31, %v1989_v33  ;;  %v1992_v63 = vadd.f32 %v2743_v59, %v1774_v34  ;;  %v1773_v37 = vadd.f32 %v1734_v47, %v1555_v58 }
 0x1b4   : > { %v1952_v12 = vpop.f32.mrf.mxu0  ;;  %v2706_v28 = vpop.f32.mrf.mxu1 }
 0x1b5   : > { %2045 = vst.msk [vmem:[#allocation2 + $0xc1] sm:$0xff] %vm520_vm2, %v2029_v10  ;;  %v2028_v49 = vmax.f32 %v2012_v61, 0.0  ;;  %v2015_v0 = vadd.f32 %v3608_v31, %v1992_v63  ;;  %v1991_v48 = vadd.f32 %v1952_v12, %v1773_v37  ;;  %v1776_v16 = vadd.f32 %v2706_v28, %v1558_v11 }
 0x1b6   : > { %v2746_v54 = vpop.f32.mrf.mxu0  ;;  %v1744_v50 = vpop.f32.mrf.mxu1 }
 0x1b7   : > { %2044 = vst.msk [vmem:[#allocation2 + $0xb1] sm:$0xff] %vm520_vm2, %v2028_v49  ;;  %v2031_v18 = vmax.f32 %v2015_v0, 0.0  ;;  %v2014_v23 = vadd.f32 %v3608_v31, %v1991_v48  ;;  %v1994_v41 = vadd.f32 %v2746_v54, %v1776_v16  ;;  %v1775_v1 = vadd.f32 %v1744_v50, %v1557_v40 }
 0x1b8   : > { %v1962_v5 = vpop.f32.mrf.mxu0  ;;  %v2709_v26 = vpop.f32.mrf.mxu1 }
 0x1b9   : > { %2047 = vst.msk [vmem:[#allocation2 + $0xe1] sm:$0xff] %vm520_vm2, %v2031_v18  ;;  %v2030_v17 = vmax.f32 %v2014_v23, 0.0  ;;  %v2017_v56 = vadd.f32 %v3608_v31, %v1994_v41  ;;  %v1993_v52 = vadd.f32 %v1962_v5, %v1775_v1  ;;  %v1778_v51 = vadd.f32 %v2709_v26, %v1560_v39 }
 0x1ba   : > { %v2749_v20 = vpop.f32.mrf.mxu0  ;;  %v1754_v29 = vpop.f32.mrf.mxu1 }
 0x1bb   : > { %2046 = vst.msk [vmem:[#allocation2 + $0xd1] sm:$0xff] %vm520_vm2, %v2030_v17  ;;  %v2033_v27 = vmax.f32 %v2017_v56, 0.0  ;;  %v2016_v30 = vadd.f32 %v3608_v31, %v1993_v52  ;;  %v1996_v6 = vadd.f32 %v2749_v20, %v1778_v51  ;;  %v1777_v19 = vadd.f32 %v1754_v29, %v1559_v44 }
 0x1bc   : > { %v1972_v32 = vpop.f32.mrf.mxu0 }
 0x1bd   : > { %2049 = vst.msk [vmem:[#allocation2 + $0x101] sm:$0xff] %vm520_vm2, %v2033_v27  ;;  %v2032_v24 = vmax.f32 %v2016_v30, 0.0  ;;  %v2019_v58 = vadd.f32 %v3608_v31, %v1996_v6  ;;  %v1995_v53 = vadd.f32 %v1972_v32, %v1777_v19 }
 0x1bf   : > { %2048 = vst.msk [vmem:[#allocation2 + $0xf1] sm:$0xff] %vm520_vm2, %v2032_v24  ;;  %v2035_v21 = vmax.f32 %v2019_v58, 0.0  ;;  %v2018_v22 = vadd.f32 %v3608_v31, %v1995_v53  ;;  %2055 = sbr.rel (%p2299_p8) target bundleno = 460 (0x1cc), region = 48 }
 0x1c1   : > { %2051 = vst.msk [vmem:[#allocation2 + $0x121] sm:$0xff] %vm520_vm2, %v2035_v21  ;;  %v2034_v55 = vmax.f32 %v2018_v22, 0.0 }
 0x1c3   : > { %2050 = vst.msk [vmem:[#allocation2 + $0x111] sm:$0xff] %vm520_vm2, %v2034_v55 }
 0x1c4   : > { %2056 = vst.msk [vmem:[%s3829_s3] sm:$0xff] %vm520_vm2, %v2020_v42  ;;  %2057 = vst.msk [vmem:[%s3829_s3 + $0x8] sm:$0xff] %vm520_vm2, %v2021_v46 }
 0x1c5   : > { %2058 = vst.msk [vmem:[%s3829_s3 + $0x10] sm:$0xff] %vm520_vm2, %v2022_v4  ;;  %2059 = vst.msk [vmem:[%s3829_s3 + $0x18] sm:$0xff] %vm520_vm2, %v2023_v2 }
 0x1c6   : > { %2060 = vst.msk [vmem:[%s3829_s3 + $0x20] sm:$0xff] %vm520_vm2, %v2024_v3  ;;  %2061 = vst.msk [vmem:[%s3829_s3 + $0x28] sm:$0xff] %vm520_vm2, %v2025_v38 }
 0x1c7   : > { %2062 = vst.msk [vmem:[%s3829_s3 + $0x30] sm:$0xff] %vm520_vm2, %v2026_v9  ;;  %2063 = vst.msk [vmem:[%s3829_s3 + $0x38] sm:$0xff] %vm520_vm2, %v2027_v43 }
 0x1c8   : > { %2064 = vst.msk [vmem:[%s3829_s3 + $0x40] sm:$0xff] %vm520_vm2, %v2028_v49  ;;  %2065 = vst.msk [vmem:[%s3829_s3 + $0x48] sm:$0xff] %vm520_vm2, %v2029_v10 }
 0x1c9   : > { %2066 = vst.msk [vmem:[%s3829_s3 + $0x50] sm:$0xff] %vm520_vm2, %v2030_v17  ;;  %2067 = vst.msk [vmem:[%s3829_s3 + $0x58] sm:$0xff] %vm520_vm2, %v2031_v18 }
 0x1ca   : > { %2068 = vst.msk [vmem:[%s3829_s3 + $0x60] sm:$0xff] %vm520_vm2, %v2032_v24  ;;  %2069 = vst.msk [vmem:[%s3829_s3 + $0x68] sm:$0xff] %vm520_vm2, %v2033_v27 }
 0x1cb   : > { %2070 = vst.msk [vmem:[%s3829_s3 + $0x70] sm:$0xff] %vm520_vm2, %v2034_v55  ;;  %2071 = vst.msk [vmem:[%s3829_s3 + $0x78] sm:$0xff] %vm520_vm2, %v2035_v21 }
 0x1cc PF: > { %p16_p9 = scmp.ge.s32.totalorder %s2959_s17, 10   ;;  %s3877_s12 = smov %s2902_s13 }
 0x1cd   : > { %s3878_s13 = smov %s2906_s14  ;;  %s3879_s14 = smov %s2969_s20 }
 0x1ce   : > { %s3880_s15 = smov %s2959_s17  ;;  %18 = sbr.rel (!%p16_p9) target bundleno = 5 (0x5), region = 98 }
 0x1d3   :  { %2083 = vsyncpa [#allocation4], 1 }
 0x1d4   :  { %2085 = vsyncpa [#allocation4 + $0x1], 1 }
 0x1d5   :  { %2086 = vsyncpa [#allocation6], 1 }
 0x1d6   :  { %2088 = vsyncpa [#allocation6 + $0x1], 1 }

</bundles_post_ra>
